<compile_context>
chip_gen: v7x
topology: tpu7x:2x2x1
jax: 0.10.0
libtpu: 0.0.40
codegen_flags: <defaults>
</compile_context>

<pallas_src>
import math

import jax
import jax.numpy as jnp
import numpy as np
from jax import lax
from jax.experimental import pallas as pl
from jax.experimental.pallas import tpu as pltpu


def _make_fused_encoder_kernel(T: int, B: int, hidden_size: int, num_layers: int):
    H = hidden_size
    L = num_layers

    def kernel(*refs):
        # refs = [x, (w_ih_0, w_hh_0, b_0), ..., (w_ih_{L-1}, w_hh_{L-1}, b_{L-1}),
        #         out, h_out, c_out, gx_scr, seq_scr]
        x_ref = refs[0]
        layer_refs = [(refs[1 + 3 * l], refs[2 + 3 * l], refs[3 + 3 * l])
                      for l in range(L)]
        out_ref, h_out_ref, c_out_ref = refs[1 + 3 * L: 4 + 3 * L]
        gx_scr, seq_scr = refs[4 + 3 * L:]

        for l in range(L):
            w_ih_ref, w_hh_ref, b_ref = layer_refs[l]
            last_layer = (l == L - 1)

            # Hoisted input projection for the whole sequence: one matmul,
            # bias folded in once (no sequential dependency on the recurrence).
            x_in = x_ref[...] if l == 0 else seq_scr[...]          # (T*B, D_l)
            gx_scr[...] = (jnp.dot(x_in, w_ih_ref[...],
                                   preferred_element_type=jnp.float32)
                           + b_ref[...])                           # (T*B, 4H)

            w_hh = w_hh_ref[...]                                   # (H, 4H), hoisted load
            h = jnp.zeros((B, H), jnp.float32)
            c = jnp.zeros((B, H), jnp.float32)

            # Statically unrolled time recurrence; h/c stay in vregs.
            for t in range(T):
                gates = (gx_scr[t * B:(t + 1) * B, :]
                         + jnp.dot(h, w_hh, preferred_element_type=jnp.float32))
                i_g = jax.nn.sigmoid(gates[:, 0 * H:1 * H])
                f_g = jax.nn.sigmoid(gates[:, 1 * H:2 * H])
                g_g = jnp.tanh(gates[:, 2 * H:3 * H])
                o_g = jax.nn.sigmoid(gates[:, 3 * H:4 * H])
                c = f_g * c + i_g * g_g
                h = o_g * jnp.tanh(c)

                if last_layer:
                    # Lane-dense output slab: out[:, t*H:(t+1)*H] = tanh(h_t).
                    out_ref[:, t * H:(t + 1) * H] = jnp.tanh(h)
                else:
                    # Inter-layer activation sequence, kept in VMEM scratch.
                    seq_scr[t * B:(t + 1) * B, :] = h

            h_out_ref[l, :, :] = h
            c_out_ref[l, :, :] = c

    return kernel


def encoder_bone_movement_forward(x_btd, params, hidden_size):
    """Equivalent of Encoder_BoneMovement.forward.

    x_btd: (B, T, input_size) float32 (batch_first, like PyTorch).
    Returns (output_encoder (B,T,H), (hidden_state (L,B,H), cell_state (L,B,H))).
    """
    B, T, D = x_btd.shape
    H = hidden_size
    L = len(params)

    # Time-major, flattened so rows [t*B, (t+1)*B) hold time step t.
    x_flat = jnp.transpose(x_btd, (1, 0, 2)).reshape(T * B, D)

    kernel = _make_fused_encoder_kernel(T, B, H, L)

    in_specs = [pl.BlockSpec((T * B, D), lambda i: (0, 0))]
    args = [x_flat]
    for l, p in enumerate(params):
        d_in = D if l == 0 else H
        in_specs += [
            pl.BlockSpec((d_in, 4 * H), lambda i: (0, 0)),   # W_ih^T (resident)
            pl.BlockSpec((H, 4 * H), lambda i: (0, 0)),      # W_hh^T (resident)
            pl.BlockSpec((1, 4 * H), lambda i: (0, 0)),      # b_ih + b_hh
        ]
        args += [p["w_ih_t"], p["w_hh_t"], p["b"]]

    grid_spec = pltpu.PrefetchScalarGridSpec(
        num_scalar_prefetch=0,
        grid=(1,),                                            # single invocation
        in_specs=in_specs,
        out_specs=[
            pl.BlockSpec((B, T * H), lambda i: (0, 0)),       # tanh(h_top) slab
            pl.BlockSpec((L, B, H), lambda i: (0, 0, 0)),     # final h per layer
            pl.BlockSpec((L, B, H), lambda i: (0, 0, 0)),     # final c per layer
        ],
        scratch_shapes=[
            pltpu.VMEM((T * B, 4 * H), jnp.float32),          # hoisted input projection
            pltpu.VMEM((T * B, H), jnp.float32),              # inter-layer sequence
        ],
    )

    out_flat, h_T, c_T = pl.pallas_call(
        kernel,
        out_shape=(
            jax.ShapeDtypeStruct((B, T * H), jnp.float32),
            jax.ShapeDtypeStruct((L, B, H), jnp.float32),
            jax.ShapeDtypeStruct((L, B, H), jnp.float32),
        ),
        grid_spec=grid_spec,
        compiler_params=pltpu.CompilerParams(
            dimension_semantics=("arbitrary",)),
    )(*args)

    # (B, T*H) -> (B, T, H): contiguous reshape, already batch_first.
    output_encoder = out_flat.reshape(B, T, H)
    return output_encoder, (h_T, c_T)


def init_encoder_params(key, input_size, hidden_size, num_layers):
    """Deterministic init mirroring nn.LSTM shapes. Gate order [i,f,g,o]."""
    params = []
    bound = 1.0 / math.sqrt(hidden_size)
    for layer in range(num_layers):
        d_in = input_size if layer == 0 else hidden_size
        key, k1, k2, k3, k4 = jax.random.split(key, 5)
        w_ih = jax.random.uniform(k1, (4 * hidden_size, d_in),
                                  minval=-bound, maxval=bound, dtype=jnp.float32)
        w_hh = jax.random.uniform(k2, (4 * hidden_size, hidden_size),
                                  minval=-bound, maxval=bound, dtype=jnp.float32)
        b_ih = jax.random.uniform(k3, (4 * hidden_size,),
                                  minval=-bound, maxval=bound, dtype=jnp.float32)
        b_hh = jax.random.uniform(k4, (4 * hidden_size,),
                                  minval=-bound, maxval=bound, dtype=jnp.float32)
        params.append({
            "w_ih_t": w_ih.T,                         # (d_in, 4H)
            "w_hh_t": w_hh.T,                         # (H, 4H)
            "b": (b_ih + b_hh)[None, :],              # (1, 4H)
        })
    return params


# ----------------------------- pure-JAX reference -----------------------------
def _reference_forward(x_btd, params, hidden_size):
    H = hidden_size
    x = jnp.transpose(x_btd, (1, 0, 2))
    hs, cs = [], []
    for layer, p in enumerate(params):
        w_ih, w_hh, b = p["w_ih_t"], p["w_hh_t"], p["b"]

        def step(carry, x_t):
            h, c = carry
            g = x_t @ w_ih + h @ w_hh + b
            i = jax.nn.sigmoid(g[:, :H])
            f = jax.nn.sigmoid(g[:, H:2 * H])
            gg = jnp.tanh(g[:, 2 * H:3 * H])
            o = jax.nn.sigmoid(g[:, 3 * H:])
            c_new = f * c + i * gg
            h_new = o * jnp.tanh(c_new)
            return (h_new, c_new), h_new

        B = x.shape[1]
        (h_T, c_T), out = lax.scan(
            step, (jnp.zeros((B, H), jnp.float32), jnp.zeros((B, H), jnp.float32)), x)
        hs.append(h_T)
        cs.append(c_T)
        x = out
    return jnp.tanh(jnp.transpose(x, (1, 0, 2))), (jnp.stack(hs), jnp.stack(cs))


if __name__ == "__main__":
    B, T = 2, 8
    INPUT_SIZE, HIDDEN_SIZE, NUM_LAYERS = 8, 32, 2

    key = jax.random.PRNGKey(0)
    key, kx = jax.random.split(key)
    x = jax.random.normal(kx, (B, T, INPUT_SIZE), dtype=jnp.float32)

    params = init_encoder_params(key, INPUT_SIZE, HIDDEN_SIZE, NUM_LAYERS)

    out, (h, c) = encoder_bone_movement_forward(x, params, HIDDEN_SIZE)
    jax.block_until_ready((out, h, c))

    ref_out, (ref_h, ref_c) = _reference_forward(x, params, HIDDEN_SIZE)
    np.testing.assert_allclose(np.asarray(out), np.asarray(ref_out), rtol=1e-4, atol=1e-4)
    np.testing.assert_allclose(np.asarray(h), np.asarray(ref_h), rtol=1e-4, atol=1e-4)
    np.testing.assert_allclose(np.asarray(c), np.asarray(ref_c), rtol=1e-4, atol=1e-4)

    assert out.shape == (B, T, HIDDEN_SIZE)
    assert h.shape == (NUM_LAYERS, B, HIDDEN_SIZE)
    assert c.shape == (NUM_LAYERS, B, HIDDEN_SIZE)
    print("KERNEL_OK")
</pallas_src>

<mosaic_0001>
module attributes {stable_mosaic.version = 11 : i64} {
  func.func @kernel(%arg0: i32, %arg1: memref<16x8xf32, #tpu.memory_space<vmem>>, %arg2: memref<8x128xf32, #tpu.memory_space<vmem>>, %arg3: memref<32x128xf32, #tpu.memory_space<vmem>>, %arg4: memref<1x128xf32, #tpu.memory_space<vmem>>, %arg5: memref<32x128xf32, #tpu.memory_space<vmem>>, %arg6: memref<32x128xf32, #tpu.memory_space<vmem>>, %arg7: memref<1x128xf32, #tpu.memory_space<vmem>>, %arg8: memref<2x256xf32, #tpu.memory_space<vmem>>, %arg9: memref<2x2x32xf32, #tpu.memory_space<vmem>>, %arg10: memref<2x2x32xf32, #tpu.memory_space<vmem>>, %arg11: memref<16x128xf32, #tpu.memory_space<vmem>>, %arg12: memref<16x32xf32, #tpu.memory_space<vmem>>) attributes {dimension_semantics = [#tpu.dimension_semantics<arbitrary>], iteration_bounds = array<i64: 1>, scalar_prefetch = 0 : i64, scratch_operands = 2 : i64, tpu.core_type = #tpu.core_type<tc>, window_params = [{pipeline_mode = #tpu.pipeline_mode<synchronous>, transform_indices = @transform_0, window_bounds = array<i64: 16, 8>}, {pipeline_mode = #tpu.pipeline_mode<synchronous>, transform_indices = @transform_1, window_bounds = array<i64: 8, 128>}, {pipeline_mode = #tpu.pipeline_mode<synchronous>, transform_indices = @transform_2, window_bounds = array<i64: 32, 128>}, {pipeline_mode = #tpu.pipeline_mode<synchronous>, transform_indices = @transform_3, window_bounds = array<i64: 1, 128>}, {pipeline_mode = #tpu.pipeline_mode<synchronous>, transform_indices = @transform_4, window_bounds = array<i64: 32, 128>}, {pipeline_mode = #tpu.pipeline_mode<synchronous>, transform_indices = @transform_5, window_bounds = array<i64: 32, 128>}, {pipeline_mode = #tpu.pipeline_mode<synchronous>, transform_indices = @transform_6, window_bounds = array<i64: 1, 128>}, {pipeline_mode = #tpu.pipeline_mode<synchronous>, transform_indices = @transform_7, window_bounds = array<i64: 2, 256>}, {pipeline_mode = #tpu.pipeline_mode<synchronous>, transform_indices = @transform_8, window_bounds = array<i64: 2, 2, 32>}, {pipeline_mode = #tpu.pipeline_mode<synchronous>, transform_indices = @transform_9, window_bounds = array<i64: 2, 2, 32>}]} {
    %c0 = arith.constant 0 : index
    %c0_0 = arith.constant 0 : index
    %0 = vector.load %arg1[%c0, %c0_0] : memref<16x8xf32, #tpu.memory_space<vmem>>, vector<16x8xf32>
    %c0_1 = arith.constant 0 : index
    %c0_2 = arith.constant 0 : index
    %1 = vector.load %arg2[%c0_1, %c0_2] : memref<8x128xf32, #tpu.memory_space<vmem>>, vector<8x128xf32>
    %cst = arith.constant dense<0.000000e+00> : vector<16x128xf32>
    %2 = tpu.matmul %0, %1, %cst {dimension_numbers = #tpu.dot_dimension_numbers<[1], [0], [0], [1], [0, 0, 1, 1], [], []>} : vector<16x8xf32>, vector<8x128xf32>, vector<16x128xf32> -> vector<16x128xf32>
    %c0_3 = arith.constant 0 : index
    %c0_4 = arith.constant 0 : index
    %3 = vector.load %arg4[%c0_3, %c0_4] : memref<1x128xf32, #tpu.memory_space<vmem>>, vector<1x128xf32>
    %4 = vector.broadcast %3 : vector<1x128xf32> to vector<16x128xf32>
    %5 = arith.addf %2, %4 : vector<16x128xf32>
    %c0_5 = arith.constant 0 : index
    %c0_6 = arith.constant 0 : index
    %6 = vector.load %arg11[%c0_5, %c0_6] : memref<16x128xf32, #tpu.memory_space<vmem>>, vector<16x128xf32>
    tpu.vector_store %arg11[%c0_5, %c0_6], %5 {strides = array<i32>} : memref<16x128xf32, #tpu.memory_space<vmem>>, vector<16x128xf32>,
    %c0_7 = arith.constant 0 : index
    %c0_8 = arith.constant 0 : index
    %7 = vector.load %arg3[%c0_7, %c0_8] : memref<32x128xf32, #tpu.memory_space<vmem>>, vector<32x128xf32>
    %cst_9 = arith.constant 0.000000e+00 : f32
    %8 = vector.broadcast %cst_9 : f32 to vector<2x32xf32>
    %cst_10 = arith.constant 0.000000e+00 : f32
    %9 = vector.broadcast %cst_10 : f32 to vector<2x32xf32>
    %c0_11 = arith.constant 0 : index
    %c0_12 = arith.constant 0 : index
    %10 = vector.load %arg11[%c0_11, %c0_12] : memref<16x128xf32, #tpu.memory_space<vmem>>, vector<2x128xf32>
    %cst_13 = arith.constant dense<0.000000e+00> : vector<2x128xf32>
    %11 = tpu.matmul %8, %7, %cst_13 {dimension_numbers = #tpu.dot_dimension_numbers<[1], [0], [0], [1], [0, 0, 1, 1], [], []>} : vector<2x32xf32>, vector<32x128xf32>, vector<2x128xf32> -> vector<2x128xf32>
    %12 = arith.addf %10, %11 : vector<2x128xf32>
    %13 = vector.extract_strided_slice %12 {offsets = [0, 0], sizes = [2, 32], strides = [1, 1]} : vector<2x128xf32> to vector<2x32xf32>
    %14 = arith.negf %13 : vector<2x32xf32>
    %15 = math.exp %14 : vector<2x32xf32>
    %cst_14 = arith.constant 1.000000e+00 : f32
    %16 = vector.broadcast %cst_14 : f32 to vector<2x32xf32>
    %17 = arith.addf %16, %15 : vector<2x32xf32>
    %18 = arith.divf %16, %17 : vector<2x32xf32>
    %19 = vector.extract_strided_slice %12 {offsets = [0, 32], sizes = [2, 32], strides = [1, 1]} : vector<2x128xf32> to vector<2x32xf32>
    %20 = arith.negf %19 : vector<2x32xf32>
    %21 = math.exp %20 : vector<2x32xf32>
    %cst_15 = arith.constant 1.000000e+00 : f32
    %22 = vector.broadcast %cst_15 : f32 to vector<2x32xf32>
    %23 = arith.addf %22, %21 : vector<2x32xf32>
    %24 = arith.divf %22, %23 : vector<2x32xf32>
    %25 = vector.extract_strided_slice %12 {offsets = [0, 64], sizes = [2, 32], strides = [1, 1]} : vector<2x128xf32> to vector<2x32xf32>
    %26 = math.tanh %25 : vector<2x32xf32>
    %27 = vector.extract_strided_slice %12 {offsets = [0, 96], sizes = [2, 32], strides = [1, 1]} : vector<2x128xf32> to vector<2x32xf32>
    %28 = arith.negf %27 : vector<2x32xf32>
    %29 = math.exp %28 : vector<2x32xf32>
    %cst_16 = arith.constant 1.000000e+00 : f32
    %30 = vector.broadcast %cst_16 : f32 to vector<2x32xf32>
    %31 = arith.addf %30, %29 : vector<2x32xf32>
    %32 = arith.divf %30, %31 : vector<2x32xf32>
    %33 = arith.mulf %24, %9 : vector<2x32xf32>
    %34 = arith.mulf %18, %26 : vector<2x32xf32>
    %35 = arith.addf %33, %34 : vector<2x32xf32>
    %36 = math.tanh %35 : vector<2x32xf32>
    %37 = arith.mulf %32, %36 : vector<2x32xf32>
    %c0_17 = arith.constant 0 : index
    %c0_18 = arith.constant 0 : index
    %38 = vector.load %arg12[%c0_17, %c0_18] : memref<16x32xf32, #tpu.memory_space<vmem>>, vector<2x32xf32>
    tpu.vector_store %arg12[%c0_17, %c0_18], %37 {strides = array<i32>} : memref<16x32xf32, #tpu.memory_space<vmem>>, vector<2x32xf32>,
    %c2 = arith.constant 2 : index
    %c0_19 = arith.constant 0 : index
    %39 = vector.load %arg11[%c2, %c0_19] : memref<16x128xf32, #tpu.memory_space<vmem>>, vector<2x128xf32>
    %cst_20 = arith.constant dense<0.000000e+00> : vector<2x128xf32>
    %40 = tpu.matmul %37, %7, %cst_20 {dimension_numbers = #tpu.dot_dimension_numbers<[1], [0], [0], [1], [0, 0, 1, 1], [], []>} : vector<2x32xf32>, vector<32x128xf32>, vector<2x128xf32> -> vector<2x128xf32>
    %41 = arith.addf %39, %40 : vector<2x128xf32>
    %42 = vector.extract_strided_slice %41 {offsets = [0, 0], sizes = [2, 32], strides = [1, 1]} : vector<2x128xf32> to vector<2x32xf32>
    %43 = arith.negf %42 : vector<2x32xf32>
    %44 = math.exp %43 : vector<2x32xf32>
    %cst_21 = arith.constant 1.000000e+00 : f32
    %45 = vector.broadcast %cst_21 : f32 to vector<2x32xf32>
    %46 = arith.addf %45, %44 : vector<2x32xf32>
    %47 = arith.divf %45, %46 : vector<2x32xf32>
    %48 = vector.extract_strided_slice %41 {offsets = [0, 32], sizes = [2, 32], strides = [1, 1]} : vector<2x128xf32> to vector<2x32xf32>
    %49 = arith.negf %48 : vector<2x32xf32>
    %50 = math.exp %49 : vector<2x32xf32>
    %cst_22 = arith.constant 1.000000e+00 : f32
    %51 = vector.broadcast %cst_22 : f32 to vector<2x32xf32>
    %52 = arith.addf %51, %50 : vector<2x32xf32>
    %53 = arith.divf %51, %52 : vector<2x32xf32>
    %54 = vector.extract_strided_slice %41 {offsets = [0, 64], sizes = [2, 32], strides = [1, 1]} : vector<2x128xf32> to vector<2x32xf32>
    %55 = math.tanh %54 : vector<2x32xf32>
    %56 = vector.extract_strided_slice %41 {offsets = [0, 96], sizes = [2, 32], strides = [1, 1]} : vector<2x128xf32> to vector<2x32xf32>
    %57 = arith.negf %56 : vector<2x32xf32>
    %58 = math.exp %57 : vector<2x32xf32>
    %cst_23 = arith.constant 1.000000e+00 : f32
    %59 = vector.broadcast %cst_23 : f32 to vector<2x32xf32>
    %60 = arith.addf %59, %58 : vector<2x32xf32>
    %61 = arith.divf %59, %60 : vector<2x32xf32>
    %62 = arith.mulf %53, %35 : vector<2x32xf32>
    %63 = arith.mulf %47, %55 : vector<2x32xf32>
    %64 = arith.addf %62, %63 : vector<2x32xf32>
    %65 = math.tanh %64 : vector<2x32xf32>
    %66 = arith.mulf %61, %65 : vector<2x32xf32>
    %c2_24 = arith.constant 2 : index
    %c0_25 = arith.constant 0 : index
    %67 = vector.load %arg12[%c2_24, %c0_25] : memref<16x32xf32, #tpu.memory_space<vmem>>, vector<2x32xf32>
    tpu.vector_store %arg12[%c2_24, %c0_25], %66 {strides = array<i32>} : memref<16x32xf32, #tpu.memory_space<vmem>>, vector<2x32xf32>,
    %c4 = arith.constant 4 : index
    %c0_26 = arith.constant 0 : index
    %68 = vector.load %arg11[%c4, %c0_26] : memref<16x128xf32, #tpu.memory_space<vmem>>, vector<2x128xf32>
    %cst_27 = arith.constant dense<0.000000e+00> : vector<2x128xf32>
    %69 = tpu.matmul %66, %7, %cst_27 {dimension_numbers = #tpu.dot_dimension_numbers<[1], [0], [0], [1], [0, 0, 1, 1], [], []>} : vector<2x32xf32>, vector<32x128xf32>, vector<2x128xf32> -> vector<2x128xf32>
    %70 = arith.addf %68, %69 : vector<2x128xf32>
    %71 = vector.extract_strided_slice %70 {offsets = [0, 0], sizes = [2, 32], strides = [1, 1]} : vector<2x128xf32> to vector<2x32xf32>
    %72 = arith.negf %71 : vector<2x32xf32>
    %73 = math.exp %72 : vector<2x32xf32>
    %cst_28 = arith.constant 1.000000e+00 : f32
    %74 = vector.broadcast %cst_28 : f32 to vector<2x32xf32>
    %75 = arith.addf %74, %73 : vector<2x32xf32>
    %76 = arith.divf %74, %75 : vector<2x32xf32>
    %77 = vector.extract_strided_slice %70 {offsets = [0, 32], sizes = [2, 32], strides = [1, 1]} : vector<2x128xf32> to vector<2x32xf32>
    %78 = arith.negf %77 : vector<2x32xf32>
    %79 = math.exp %78 : vector<2x32xf32>
    %cst_29 = arith.constant 1.000000e+00 : f32
    %80 = vector.broadcast %cst_29 : f32 to vector<2x32xf32>
    %81 = arith.addf %80, %79 : vector<2x32xf32>
    %82 = arith.divf %80, %81 : vector<2x32xf32>
    %83 = vector.extract_strided_slice %70 {offsets = [0, 64], sizes = [2, 32], strides = [1, 1]} : vector<2x128xf32> to vector<2x32xf32>
    %84 = math.tanh %83 : vector<2x32xf32>
    %85 = vector.extract_strided_slice %70 {offsets = [0, 96], sizes = [2, 32], strides = [1, 1]} : vector<2x128xf32> to vector<2x32xf32>
    %86 = arith.negf %85 : vector<2x32xf32>
    %87 = math.exp %86 : vector<2x32xf32>
    %cst_30 = arith.constant 1.000000e+00 : f32
    %88 = vector.broadcast %cst_30 : f32 to vector<2x32xf32>
    %89 = arith.addf %88, %87 : vector<2x32xf32>
    %90 = arith.divf %88, %89 : vector<2x32xf32>
    %91 = arith.mulf %82, %64 : vector<2x32xf32>
    %92 = arith.mulf %76, %84 : vector<2x32xf32>
    %93 = arith.addf %91, %92 : vector<2x32xf32>
    %94 = math.tanh %93 : vector<2x32xf32>
    %95 = arith.mulf %90, %94 : vector<2x32xf32>
    %c4_31 = arith.constant 4 : index
    %c0_32 = arith.constant 0 : index
    %96 = vector.load %arg12[%c4_31, %c0_32] : memref<16x32xf32, #tpu.memory_space<vmem>>, vector<2x32xf32>
    tpu.vector_store %arg12[%c4_31, %c0_32], %95 {strides = array<i32>} : memref<16x32xf32, #tpu.memory_space<vmem>>, vector<2x32xf32>,
    %c6 = arith.constant 6 : index
    %c0_33 = arith.constant 0 : index
    %97 = vector.load %arg11[%c6, %c0_33] : memref<16x128xf32, #tpu.memory_space<vmem>>, vector<2x128xf32>
    %cst_34 = arith.constant dense<0.000000e+00> : vector<2x128xf32>
    %98 = tpu.matmul %95, %7, %cst_34 {dimension_numbers = #tpu.dot_dimension_numbers<[1], [0], [0], [1], [0, 0, 1, 1], [], []>} : vector<2x32xf32>, vector<32x128xf32>, vector<2x128xf32> -> vector<2x128xf32>
    %99 = arith.addf %97, %98 : vector<2x128xf32>
    %100 = vector.extract_strided_slice %99 {offsets = [0, 0], sizes = [2, 32], strides = [1, 1]} : vector<2x128xf32> to vector<2x32xf32>
    %101 = arith.negf %100 : vector<2x32xf32>
    %102 = math.exp %101 : vector<2x32xf32>
    %cst_35 = arith.constant 1.000000e+00 : f32
    %103 = vector.broadcast %cst_35 : f32 to vector<2x32xf32>
    %104 = arith.addf %103, %102 : vector<2x32xf32>
    %105 = arith.divf %103, %104 : vector<2x32xf32>
    %106 = vector.extract_strided_slice %99 {offsets = [0, 32], sizes = [2, 32], strides = [1, 1]} : vector<2x128xf32> to vector<2x32xf32>
    %107 = arith.negf %106 : vector<2x32xf32>
    %108 = math.exp %107 : vector<2x32xf32>
    %cst_36 = arith.constant 1.000000e+00 : f32
    %109 = vector.broadcast %cst_36 : f32 to vector<2x32xf32>
    %110 = arith.addf %109, %108 : vector<2x32xf32>
    %111 = arith.divf %109, %110 : vector<2x32xf32>
    %112 = vector.extract_strided_slice %99 {offsets = [0, 64], sizes = [2, 32], strides = [1, 1]} : vector<2x128xf32> to vector<2x32xf32>
    %113 = math.tanh %112 : vector<2x32xf32>
    %114 = vector.extract_strided_slice %99 {offsets = [0, 96], sizes = [2, 32], strides = [1, 1]} : vector<2x128xf32> to vector<2x32xf32>
    %115 = arith.negf %114 : vector<2x32xf32>
    %116 = math.exp %115 : vector<2x32xf32>
    %cst_37 = arith.constant 1.000000e+00 : f32
    %117 = vector.broadcast %cst_37 : f32 to vector<2x32xf32>
    %118 = arith.addf %117, %116 : vector<2x32xf32>
    %119 = arith.divf %117, %118 : vector<2x32xf32>
    %120 = arith.mulf %111, %93 : vector<2x32xf32>
    %121 = arith.mulf %105, %113 : vector<2x32xf32>
    %122 = arith.addf %120, %121 : vector<2x32xf32>
    %123 = math.tanh %122 : vector<2x32xf32>
    %124 = arith.mulf %119, %123 : vector<2x32xf32>
    %c6_38 = arith.constant 6 : index
    %c0_39 = arith.constant 0 : index
    %125 = vector.load %arg12[%c6_38, %c0_39] : memref<16x32xf32, #tpu.memory_space<vmem>>, vector<2x32xf32>
    tpu.vector_store %arg12[%c6_38, %c0_39], %124 {strides = array<i32>} : memref<16x32xf32, #tpu.memory_space<vmem>>, vector<2x32xf32>,
    %c8 = arith.constant 8 : index
    %c0_40 = arith.constant 0 : index
    %126 = vector.load %arg11[%c8, %c0_40] : memref<16x128xf32, #tpu.memory_space<vmem>>, vector<2x128xf32>
    %cst_41 = arith.constant dense<0.000000e+00> : vector<2x128xf32>
    %127 = tpu.matmul %124, %7, %cst_41 {dimension_numbers = #tpu.dot_dimension_numbers<[1], [0], [0], [1], [0, 0, 1, 1], [], []>} : vector<2x32xf32>, vector<32x128xf32>, vector<2x128xf32> -> vector<2x128xf32>
    %128 = arith.addf %126, %127 : vector<2x128xf32>
    %129 = vector.extract_strided_slice %128 {offsets = [0, 0], sizes = [2, 32], strides = [1, 1]} : vector<2x128xf32> to vector<2x32xf32>
    %130 = arith.negf %129 : vector<2x32xf32>
    %131 = math.exp %130 : vector<2x32xf32>
    %cst_42 = arith.constant 1.000000e+00 : f32
    %132 = vector.broadcast %cst_42 : f32 to vector<2x32xf32>
    %133 = arith.addf %132, %131 : vector<2x32xf32>
    %134 = arith.divf %132, %133 : vector<2x32xf32>
    %135 = vector.extract_strided_slice %128 {offsets = [0, 32], sizes = [2, 32], strides = [1, 1]} : vector<2x128xf32> to vector<2x32xf32>
    %136 = arith.negf %135 : vector<2x32xf32>
    %137 = math.exp %136 : vector<2x32xf32>
    %cst_43 = arith.constant 1.000000e+00 : f32
    %138 = vector.broadcast %cst_43 : f32 to vector<2x32xf32>
    %139 = arith.addf %138, %137 : vector<2x32xf32>
    %140 = arith.divf %138, %139 : vector<2x32xf32>
    %141 = vector.extract_strided_slice %128 {offsets = [0, 64], sizes = [2, 32], strides = [1, 1]} : vector<2x128xf32> to vector<2x32xf32>
    %142 = math.tanh %141 : vector<2x32xf32>
    %143 = vector.extract_strided_slice %128 {offsets = [0, 96], sizes = [2, 32], strides = [1, 1]} : vector<2x128xf32> to vector<2x32xf32>
    %144 = arith.negf %143 : vector<2x32xf32>
    %145 = math.exp %144 : vector<2x32xf32>
    %cst_44 = arith.constant 1.000000e+00 : f32
    %146 = vector.broadcast %cst_44 : f32 to vector<2x32xf32>
    %147 = arith.addf %146, %145 : vector<2x32xf32>
    %148 = arith.divf %146, %147 : vector<2x32xf32>
    %149 = arith.mulf %140, %122 : vector<2x32xf32>
    %150 = arith.mulf %134, %142 : vector<2x32xf32>
    %151 = arith.addf %149, %150 : vector<2x32xf32>
    %152 = math.tanh %151 : vector<2x32xf32>
    %153 = arith.mulf %148, %152 : vector<2x32xf32>
    %c8_45 = arith.constant 8 : index
    %c0_46 = arith.constant 0 : index
    %154 = vector.load %arg12[%c8_45, %c0_46] : memref<16x32xf32, #tpu.memory_space<vmem>>, vector<2x32xf32>
    tpu.vector_store %arg12[%c8_45, %c0_46], %153 {strides = array<i32>} : memref<16x32xf32, #tpu.memory_space<vmem>>, vector<2x32xf32>,
    %c10 = arith.constant 10 : index
    %c0_47 = arith.constant 0 : index
    %155 = vector.load %arg11[%c10, %c0_47] : memref<16x128xf32, #tpu.memory_space<vmem>>, vector<2x128xf32>
    %cst_48 = arith.constant dense<0.000000e+00> : vector<2x128xf32>
    %156 = tpu.matmul %153, %7, %cst_48 {dimension_numbers = #tpu.dot_dimension_numbers<[1], [0], [0], [1], [0, 0, 1, 1], [], []>} : vector<2x32xf32>, vector<32x128xf32>, vector<2x128xf32> -> vector<2x128xf32>
    %157 = arith.addf %155, %156 : vector<2x128xf32>
    %158 = vector.extract_strided_slice %157 {offsets = [0, 0], sizes = [2, 32], strides = [1, 1]} : vector<2x128xf32> to vector<2x32xf32>
    %159 = arith.negf %158 : vector<2x32xf32>
    %160 = math.exp %159 : vector<2x32xf32>
    %cst_49 = arith.constant 1.000000e+00 : f32
    %161 = vector.broadcast %cst_49 : f32 to vector<2x32xf32>
    %162 = arith.addf %161, %160 : vector<2x32xf32>
    %163 = arith.divf %161, %162 : vector<2x32xf32>
    %164 = vector.extract_strided_slice %157 {offsets = [0, 32], sizes = [2, 32], strides = [1, 1]} : vector<2x128xf32> to vector<2x32xf32>
    %165 = arith.negf %164 : vector<2x32xf32>
    %166 = math.exp %165 : vector<2x32xf32>
    %cst_50 = arith.constant 1.000000e+00 : f32
    %167 = vector.broadcast %cst_50 : f32 to vector<2x32xf32>
    %168 = arith.addf %167, %166 : vector<2x32xf32>
    %169 = arith.divf %167, %168 : vector<2x32xf32>
    %170 = vector.extract_strided_slice %157 {offsets = [0, 64], sizes = [2, 32], strides = [1, 1]} : vector<2x128xf32> to vector<2x32xf32>
    %171 = math.tanh %170 : vector<2x32xf32>
    %172 = vector.extract_strided_slice %157 {offsets = [0, 96], sizes = [2, 32], strides = [1, 1]} : vector<2x128xf32> to vector<2x32xf32>
    %173 = arith.negf %172 : vector<2x32xf32>
    %174 = math.exp %173 : vector<2x32xf32>
    %cst_51 = arith.constant 1.000000e+00 : f32
    %175 = vector.broadcast %cst_51 : f32 to vector<2x32xf32>
    %176 = arith.addf %175, %174 : vector<2x32xf32>
    %177 = arith.divf %175, %176 : vector<2x32xf32>
    %178 = arith.mulf %169, %151 : vector<2x32xf32>
    %179 = arith.mulf %163, %171 : vector<2x32xf32>
    %180 = arith.addf %178, %179 : vector<2x32xf32>
    %181 = math.tanh %180 : vector<2x32xf32>
    %182 = arith.mulf %177, %181 : vector<2x32xf32>
    %c10_52 = arith.constant 10 : index
    %c0_53 = arith.constant 0 : index
    %183 = vector.load %arg12[%c10_52, %c0_53] : memref<16x32xf32, #tpu.memory_space<vmem>>, vector<2x32xf32>
    tpu.vector_store %arg12[%c10_52, %c0_53], %182 {strides = array<i32>} : memref<16x32xf32, #tpu.memory_space<vmem>>, vector<2x32xf32>,
    %c12 = arith.constant 12 : index
    %c0_54 = arith.constant 0 : index
    %184 = vector.load %arg11[%c12, %c0_54] : memref<16x128xf32, #tpu.memory_space<vmem>>, vector<2x128xf32>
    %cst_55 = arith.constant dense<0.000000e+00> : vector<2x128xf32>
    %185 = tpu.matmul %182, %7, %cst_55 {dimension_numbers = #tpu.dot_dimension_numbers<[1], [0], [0], [1], [0, 0, 1, 1], [], []>} : vector<2x32xf32>, vector<32x128xf32>, vector<2x128xf32> -> vector<2x128xf32>
    %186 = arith.addf %184, %185 : vector<2x128xf32>
    %187 = vector.extract_strided_slice %186 {offsets = [0, 0], sizes = [2, 32], strides = [1, 1]} : vector<2x128xf32> to vector<2x32xf32>
    %188 = arith.negf %187 : vector<2x32xf32>
    %189 = math.exp %188 : vector<2x32xf32>
    %cst_56 = arith.constant 1.000000e+00 : f32
    %190 = vector.broadcast %cst_56 : f32 to vector<2x32xf32>
    %191 = arith.addf %190, %189 : vector<2x32xf32>
    %192 = arith.divf %190, %191 : vector<2x32xf32>
    %193 = vector.extract_strided_slice %186 {offsets = [0, 32], sizes = [2, 32], strides = [1, 1]} : vector<2x128xf32> to vector<2x32xf32>
    %194 = arith.negf %193 : vector<2x32xf32>
    %195 = math.exp %194 : vector<2x32xf32>
    %cst_57 = arith.constant 1.000000e+00 : f32
    %196 = vector.broadcast %cst_57 : f32 to vector<2x32xf32>
    %197 = arith.addf %196, %195 : vector<2x32xf32>
    %198 = arith.divf %196, %197 : vector<2x32xf32>
    %199 = vector.extract_strided_slice %186 {offsets = [0, 64], sizes = [2, 32], strides = [1, 1]} : vector<2x128xf32> to vector<2x32xf32>
    %200 = math.tanh %199 : vector<2x32xf32>
    %201 = vector.extract_strided_slice %186 {offsets = [0, 96], sizes = [2, 32], strides = [1, 1]} : vector<2x128xf32> to vector<2x32xf32>
    %202 = arith.negf %201 : vector<2x32xf32>
    %203 = math.exp %202 : vector<2x32xf32>
    %cst_58 = arith.constant 1.000000e+00 : f32
    %204 = vector.broadcast %cst_58 : f32 to vector<2x32xf32>
    %205 = arith.addf %204, %203 : vector<2x32xf32>
    %206 = arith.divf %204, %205 : vector<2x32xf32>
    %207 = arith.mulf %198, %180 : vector<2x32xf32>
    %208 = arith.mulf %192, %200 : vector<2x32xf32>
    %209 = arith.addf %207, %208 : vector<2x32xf32>
    %210 = math.tanh %209 : vector<2x32xf32>
    %211 = arith.mulf %206, %210 : vector<2x32xf32>
    %c12_59 = arith.constant 12 : index
    %c0_60 = arith.constant 0 : index
    %212 = vector.load %arg12[%c12_59, %c0_60] : memref<16x32xf32, #tpu.memory_space<vmem>>, vector<2x32xf32>
    tpu.vector_store %arg12[%c12_59, %c0_60], %211 {strides = array<i32>} : memref<16x32xf32, #tpu.memory_space<vmem>>, vector<2x32xf32>,
    %c14 = arith.constant 14 : index
    %c0_61 = arith.constant 0 : index
    %213 = vector.load %arg11[%c14, %c0_61] : memref<16x128xf32, #tpu.memory_space<vmem>>, vector<2x128xf32>
    %cst_62 = arith.constant dense<0.000000e+00> : vector<2x128xf32>
    %214 = tpu.matmul %211, %7, %cst_62 {dimension_numbers = #tpu.dot_dimension_numbers<[1], [0], [0], [1], [0, 0, 1, 1], [], []>} : vector<2x32xf32>, vector<32x128xf32>, vector<2x128xf32> -> vector<2x128xf32>
    %215 = arith.addf %213, %214 : vector<2x128xf32>
    %216 = vector.extract_strided_slice %215 {offsets = [0, 0], sizes = [2, 32], strides = [1, 1]} : vector<2x128xf32> to vector<2x32xf32>
    %217 = arith.negf %216 : vector<2x32xf32>
    %218 = math.exp %217 : vector<2x32xf32>
    %cst_63 = arith.constant 1.000000e+00 : f32
    %219 = vector.broadcast %cst_63 : f32 to vector<2x32xf32>
    %220 = arith.addf %219, %218 : vector<2x32xf32>
    %221 = arith.divf %219, %220 : vector<2x32xf32>
    %222 = vector.extract_strided_slice %215 {offsets = [0, 32], sizes = [2, 32], strides = [1, 1]} : vector<2x128xf32> to vector<2x32xf32>
    %223 = arith.negf %222 : vector<2x32xf32>
    %224 = math.exp %223 : vector<2x32xf32>
    %cst_64 = arith.constant 1.000000e+00 : f32
    %225 = vector.broadcast %cst_64 : f32 to vector<2x32xf32>
    %226 = arith.addf %225, %224 : vector<2x32xf32>
    %227 = arith.divf %225, %226 : vector<2x32xf32>
    %228 = vector.extract_strided_slice %215 {offsets = [0, 64], sizes = [2, 32], strides = [1, 1]} : vector<2x128xf32> to vector<2x32xf32>
    %229 = math.tanh %228 : vector<2x32xf32>
    %230 = vector.extract_strided_slice %215 {offsets = [0, 96], sizes = [2, 32], strides = [1, 1]} : vector<2x128xf32> to vector<2x32xf32>
    %231 = arith.negf %230 : vector<2x32xf32>
    %232 = math.exp %231 : vector<2x32xf32>
    %cst_65 = arith.constant 1.000000e+00 : f32
    %233 = vector.broadcast %cst_65 : f32 to vector<2x32xf32>
    %234 = arith.addf %233, %232 : vector<2x32xf32>
    %235 = arith.divf %233, %234 : vector<2x32xf32>
    %236 = arith.mulf %227, %209 : vector<2x32xf32>
    %237 = arith.mulf %221, %229 : vector<2x32xf32>
    %238 = arith.addf %236, %237 : vector<2x32xf32>
    %239 = math.tanh %238 : vector<2x32xf32>
    %240 = arith.mulf %235, %239 : vector<2x32xf32>
    %c14_66 = arith.constant 14 : index
    %c0_67 = arith.constant 0 : index
    %241 = vector.load %arg12[%c14_66, %c0_67] : memref<16x32xf32, #tpu.memory_space<vmem>>, vector<2x32xf32>
    tpu.vector_store %arg12[%c14_66, %c0_67], %240 {strides = array<i32>} : memref<16x32xf32, #tpu.memory_space<vmem>>, vector<2x32xf32>,
    %c0_68 = arith.constant 0 : index
    %c0_69 = arith.constant 0 : index
    %c0_70 = arith.constant 0 : index
    %242 = vector.load %arg9[%c0_68, %c0_69, %c0_70] : memref<2x2x32xf32, #tpu.memory_space<vmem>>, vector<1x2x32xf32>
    %243 = vector.shape_cast %242 : vector<1x2x32xf32> to vector<2x32xf32>
    %244 = vector.shape_cast %240 : vector<2x32xf32> to vector<1x2x32xf32>
    tpu.vector_store %arg9[%c0_68, %c0_69, %c0_70], %244 {strides = array<i32>} : memref<2x2x32xf32, #tpu.memory_space<vmem>>, vector<1x2x32xf32>,
    %c0_71 = arith.constant 0 : index
    %c0_72 = arith.constant 0 : index
    %c0_73 = arith.constant 0 : index
    %245 = vector.load %arg10[%c0_71, %c0_72, %c0_73] : memref<2x2x32xf32, #tpu.memory_space<vmem>>, vector<1x2x32xf32>
    %246 = vector.shape_cast %245 : vector<1x2x32xf32> to vector<2x32xf32>
    %247 = vector.shape_cast %238 : vector<2x32xf32> to vector<1x2x32xf32>
    tpu.vector_store %arg10[%c0_71, %c0_72, %c0_73], %247 {strides = array<i32>} : memref<2x2x32xf32, #tpu.memory_space<vmem>>, vector<1x2x32xf32>,
    %c0_74 = arith.constant 0 : index
    %c0_75 = arith.constant 0 : index
    %248 = vector.load %arg12[%c0_74, %c0_75] : memref<16x32xf32, #tpu.memory_space<vmem>>, vector<16x32xf32>
    %c0_76 = arith.constant 0 : index
    %c0_77 = arith.constant 0 : index
    %249 = vector.load %arg5[%c0_76, %c0_77] : memref<32x128xf32, #tpu.memory_space<vmem>>, vector<32x128xf32>
    %cst_78 = arith.constant dense<0.000000e+00> : vector<16x128xf32>
    %250 = tpu.matmul %248, %249, %cst_78 {dimension_numbers = #tpu.dot_dimension_numbers<[1], [0], [0], [1], [0, 0, 1, 1], [], []>} : vector<16x32xf32>, vector<32x128xf32>, vector<16x128xf32> -> vector<16x128xf32>
    %c0_79 = arith.constant 0 : index
    %c0_80 = arith.constant 0 : index
    %251 = vector.load %arg7[%c0_79, %c0_80] : memref<1x128xf32, #tpu.memory_space<vmem>>, vector<1x128xf32>
    %252 = vector.broadcast %251 : vector<1x128xf32> to vector<16x128xf32>
    %253 = arith.addf %250, %252 : vector<16x128xf32>
    %c0_81 = arith.constant 0 : index
    %c0_82 = arith.constant 0 : index
    %254 = vector.load %arg11[%c0_81, %c0_82] : memref<16x128xf32, #tpu.memory_space<vmem>>, vector<16x128xf32>
    tpu.vector_store %arg11[%c0_81, %c0_82], %253 {strides = array<i32>} : memref<16x128xf32, #tpu.memory_space<vmem>>, vector<16x128xf32>,
    %c0_83 = arith.constant 0 : index
    %c0_84 = arith.constant 0 : index
    %255 = vector.load %arg6[%c0_83, %c0_84] : memref<32x128xf32, #tpu.memory_space<vmem>>, vector<32x128xf32>
    %cst_85 = arith.constant 0.000000e+00 : f32
    %256 = vector.broadcast %cst_85 : f32 to vector<2x32xf32>
    %cst_86 = arith.constant 0.000000e+00 : f32
    %257 = vector.broadcast %cst_86 : f32 to vector<2x32xf32>
    %c0_87 = arith.constant 0 : index
    %c0_88 = arith.constant 0 : index
    %258 = vector.load %arg11[%c0_87, %c0_88] : memref<16x128xf32, #tpu.memory_space<vmem>>, vector<2x128xf32>
    %cst_89 = arith.constant dense<0.000000e+00> : vector<2x128xf32>
    %259 = tpu.matmul %256, %255, %cst_89 {dimension_numbers = #tpu.dot_dimension_numbers<[1], [0], [0], [1], [0, 0, 1, 1], [], []>} : vector<2x32xf32>, vector<32x128xf32>, vector<2x128xf32> -> vector<2x128xf32>
    %260 = arith.addf %258, %259 : vector<2x128xf32>
    %261 = vector.extract_strided_slice %260 {offsets = [0, 0], sizes = [2, 32], strides = [1, 1]} : vector<2x128xf32> to vector<2x32xf32>
    %262 = arith.negf %261 : vector<2x32xf32>
    %263 = math.exp %262 : vector<2x32xf32>
    %cst_90 = arith.constant 1.000000e+00 : f32
    %264 = vector.broadcast %cst_90 : f32 to vector<2x32xf32>
    %265 = arith.addf %264, %263 : vector<2x32xf32>
    %266 = arith.divf %264, %265 : vector<2x32xf32>
    %267 = vector.extract_strided_slice %260 {offsets = [0, 32], sizes = [2, 32], strides = [1, 1]} : vector<2x128xf32> to vector<2x32xf32>
    %268 = arith.negf %267 : vector<2x32xf32>
    %269 = math.exp %268 : vector<2x32xf32>
    %cst_91 = arith.constant 1.000000e+00 : f32
    %270 = vector.broadcast %cst_91 : f32 to vector<2x32xf32>
    %271 = arith.addf %270, %269 : vector<2x32xf32>
    %272 = arith.divf %270, %271 : vector<2x32xf32>
    %273 = vector.extract_strided_slice %260 {offsets = [0, 64], sizes = [2, 32], strides = [1, 1]} : vector<2x128xf32> to vector<2x32xf32>
    %274 = math.tanh %273 : vector<2x32xf32>
    %275 = vector.extract_strided_slice %260 {offsets = [0, 96], sizes = [2, 32], strides = [1, 1]} : vector<2x128xf32> to vector<2x32xf32>
    %276 = arith.negf %275 : vector<2x32xf32>
    %277 = math.exp %276 : vector<2x32xf32>
    %cst_92 = arith.constant 1.000000e+00 : f32
    %278 = vector.broadcast %cst_92 : f32 to vector<2x32xf32>
    %279 = arith.addf %278, %277 : vector<2x32xf32>
    %280 = arith.divf %278, %279 : vector<2x32xf32>
    %281 = arith.mulf %272, %257 : vector<2x32xf32>
    %282 = arith.mulf %266, %274 : vector<2x32xf32>
    %283 = arith.addf %281, %282 : vector<2x32xf32>
    %284 = math.tanh %283 : vector<2x32xf32>
    %285 = arith.mulf %280, %284 : vector<2x32xf32>
    %286 = math.tanh %285 : vector<2x32xf32>
    %c0_93 = arith.constant 0 : index
    %c0_94 = arith.constant 0 : index
    %287 = vector.load %arg8[%c0_93, %c0_94] : memref<2x256xf32, #tpu.memory_space<vmem>>, vector<2x32xf32>
    tpu.vector_store %arg8[%c0_93, %c0_94], %286 {strides = array<i32>} : memref<2x256xf32, #tpu.memory_space<vmem>>, vector<2x32xf32>,
    %c2_95 = arith.constant 2 : index
    %c0_96 = arith.constant 0 : index
    %288 = vector.load %arg11[%c2_95, %c0_96] : memref<16x128xf32, #tpu.memory_space<vmem>>, vector<2x128xf32>
    %cst_97 = arith.constant dense<0.000000e+00> : vector<2x128xf32>
    %289 = tpu.matmul %285, %255, %cst_97 {dimension_numbers = #tpu.dot_dimension_numbers<[1], [0], [0], [1], [0, 0, 1, 1], [], []>} : vector<2x32xf32>, vector<32x128xf32>, vector<2x128xf32> -> vector<2x128xf32>
    %290 = arith.addf %288, %289 : vector<2x128xf32>
    %291 = vector.extract_strided_slice %290 {offsets = [0, 0], sizes = [2, 32], strides = [1, 1]} : vector<2x128xf32> to vector<2x32xf32>
    %292 = arith.negf %291 : vector<2x32xf32>
    %293 = math.exp %292 : vector<2x32xf32>
    %cst_98 = arith.constant 1.000000e+00 : f32
    %294 = vector.broadcast %cst_98 : f32 to vector<2x32xf32>
    %295 = arith.addf %294, %293 : vector<2x32xf32>
    %296 = arith.divf %294, %295 : vector<2x32xf32>
    %297 = vector.extract_strided_slice %290 {offsets = [0, 32], sizes = [2, 32], strides = [1, 1]} : vector<2x128xf32> to vector<2x32xf32>
    %298 = arith.negf %297 : vector<2x32xf32>
    %299 = math.exp %298 : vector<2x32xf32>
    %cst_99 = arith.constant 1.000000e+00 : f32
    %300 = vector.broadcast %cst_99 : f32 to vector<2x32xf32>
    %301 = arith.addf %300, %299 : vector<2x32xf32>
    %302 = arith.divf %300, %301 : vector<2x32xf32>
    %303 = vector.extract_strided_slice %290 {offsets = [0, 64], sizes = [2, 32], strides = [1, 1]} : vector<2x128xf32> to vector<2x32xf32>
    %304 = math.tanh %303 : vector<2x32xf32>
    %305 = vector.extract_strided_slice %290 {offsets = [0, 96], sizes = [2, 32], strides = [1, 1]} : vector<2x128xf32> to vector<2x32xf32>
    %306 = arith.negf %305 : vector<2x32xf32>
    %307 = math.exp %306 : vector<2x32xf32>
    %cst_100 = arith.constant 1.000000e+00 : f32
    %308 = vector.broadcast %cst_100 : f32 to vector<2x32xf32>
    %309 = arith.addf %308, %307 : vector<2x32xf32>
    %310 = arith.divf %308, %309 : vector<2x32xf32>
    %311 = arith.mulf %302, %283 : vector<2x32xf32>
    %312 = arith.mulf %296, %304 : vector<2x32xf32>
    %313 = arith.addf %311, %312 : vector<2x32xf32>
    %314 = math.tanh %313 : vector<2x32xf32>
    %315 = arith.mulf %310, %314 : vector<2x32xf32>
    %316 = math.tanh %315 : vector<2x32xf32>
    %c0_101 = arith.constant 0 : index
    %c32 = arith.constant 32 : index
    %317 = vector.load %arg8[%c0_101, %c32] : memref<2x256xf32, #tpu.memory_space<vmem>>, vector<2x32xf32>
    tpu.vector_store %arg8[%c0_101, %c32], %316 {strides = array<i32>} : memref<2x256xf32, #tpu.memory_space<vmem>>, vector<2x32xf32>,
    %c4_102 = arith.constant 4 : index
    %c0_103 = arith.constant 0 : index
    %318 = vector.load %arg11[%c4_102, %c0_103] : memref<16x128xf32, #tpu.memory_space<vmem>>, vector<2x128xf32>
    %cst_104 = arith.constant dense<0.000000e+00> : vector<2x128xf32>
    %319 = tpu.matmul %315, %255, %cst_104 {dimension_numbers = #tpu.dot_dimension_numbers<[1], [0], [0], [1], [0, 0, 1, 1], [], []>} : vector<2x32xf32>, vector<32x128xf32>, vector<2x128xf32> -> vector<2x128xf32>
    %320 = arith.addf %318, %319 : vector<2x128xf32>
    %321 = vector.extract_strided_slice %320 {offsets = [0, 0], sizes = [2, 32], strides = [1, 1]} : vector<2x128xf32> to vector<2x32xf32>
    %322 = arith.negf %321 : vector<2x32xf32>
    %323 = math.exp %322 : vector<2x32xf32>
    %cst_105 = arith.constant 1.000000e+00 : f32
    %324 = vector.broadcast %cst_105 : f32 to vector<2x32xf32>
    %325 = arith.addf %324, %323 : vector<2x32xf32>
    %326 = arith.divf %324, %325 : vector<2x32xf32>
    %327 = vector.extract_strided_slice %320 {offsets = [0, 32], sizes = [2, 32], strides = [1, 1]} : vector<2x128xf32> to vector<2x32xf32>
    %328 = arith.negf %327 : vector<2x32xf32>
    %329 = math.exp %328 : vector<2x32xf32>
    %cst_106 = arith.constant 1.000000e+00 : f32
    %330 = vector.broadcast %cst_106 : f32 to vector<2x32xf32>
    %331 = arith.addf %330, %329 : vector<2x32xf32>
    %332 = arith.divf %330, %331 : vector<2x32xf32>
    %333 = vector.extract_strided_slice %320 {offsets = [0, 64], sizes = [2, 32], strides = [1, 1]} : vector<2x128xf32> to vector<2x32xf32>
    %334 = math.tanh %333 : vector<2x32xf32>
    %335 = vector.extract_strided_slice %320 {offsets = [0, 96], sizes = [2, 32], strides = [1, 1]} : vector<2x128xf32> to vector<2x32xf32>
    %336 = arith.negf %335 : vector<2x32xf32>
    %337 = math.exp %336 : vector<2x32xf32>
    %cst_107 = arith.constant 1.000000e+00 : f32
    %338 = vector.broadcast %cst_107 : f32 to vector<2x32xf32>
    %339 = arith.addf %338, %337 : vector<2x32xf32>
    %340 = arith.divf %338, %339 : vector<2x32xf32>
    %341 = arith.mulf %332, %313 : vector<2x32xf32>
    %342 = arith.mulf %326, %334 : vector<2x32xf32>
    %343 = arith.addf %341, %342 : vector<2x32xf32>
    %344 = math.tanh %343 : vector<2x32xf32>
    %345 = arith.mulf %340, %344 : vector<2x32xf32>
    %346 = math.tanh %345 : vector<2x32xf32>
    %c0_108 = arith.constant 0 : index
    %c64 = arith.constant 64 : index
    %347 = vector.load %arg8[%c0_108, %c64] : memref<2x256xf32, #tpu.memory_space<vmem>>, vector<2x32xf32>
    tpu.vector_store %arg8[%c0_108, %c64], %346 {strides = array<i32>} : memref<2x256xf32, #tpu.memory_space<vmem>>, vector<2x32xf32>,
    %c6_109 = arith.constant 6 : index
    %c0_110 = arith.constant 0 : index
    %348 = vector.load %arg11[%c6_109, %c0_110] : memref<16x128xf32, #tpu.memory_space<vmem>>, vector<2x128xf32>
    %cst_111 = arith.constant dense<0.000000e+00> : vector<2x128xf32>
    %349 = tpu.matmul %345, %255, %cst_111 {dimension_numbers = #tpu.dot_dimension_numbers<[1], [0], [0], [1], [0, 0, 1, 1], [], []>} : vector<2x32xf32>, vector<32x128xf32>, vector<2x128xf32> -> vector<2x128xf32>
    %350 = arith.addf %348, %349 : vector<2x128xf32>
    %351 = vector.extract_strided_slice %350 {offsets = [0, 0], sizes = [2, 32], strides = [1, 1]} : vector<2x128xf32> to vector<2x32xf32>
    %352 = arith.negf %351 : vector<2x32xf32>
    %353 = math.exp %352 : vector<2x32xf32>
    %cst_112 = arith.constant 1.000000e+00 : f32
    %354 = vector.broadcast %cst_112 : f32 to vector<2x32xf32>
    %355 = arith.addf %354, %353 : vector<2x32xf32>
    %356 = arith.divf %354, %355 : vector<2x32xf32>
    %357 = vector.extract_strided_slice %350 {offsets = [0, 32], sizes = [2, 32], strides = [1, 1]} : vector<2x128xf32> to vector<2x32xf32>
    %358 = arith.negf %357 : vector<2x32xf32>
    %359 = math.exp %358 : vector<2x32xf32>
    %cst_113 = arith.constant 1.000000e+00 : f32
    %360 = vector.broadcast %cst_113 : f32 to vector<2x32xf32>
    %361 = arith.addf %360, %359 : vector<2x32xf32>
    %362 = arith.divf %360, %361 : vector<2x32xf32>
    %363 = vector.extract_strided_slice %350 {offsets = [0, 64], sizes = [2, 32], strides = [1, 1]} : vector<2x128xf32> to vector<2x32xf32>
    %364 = math.tanh %363 : vector<2x32xf32>
    %365 = vector.extract_strided_slice %350 {offsets = [0, 96], sizes = [2, 32], strides = [1, 1]} : vector<2x128xf32> to vector<2x32xf32>
    %366 = arith.negf %365 : vector<2x32xf32>
    %367 = math.exp %366 : vector<2x32xf32>
    %cst_114 = arith.constant 1.000000e+00 : f32
    %368 = vector.broadcast %cst_114 : f32 to vector<2x32xf32>
    %369 = arith.addf %368, %367 : vector<2x32xf32>
    %370 = arith.divf %368, %369 : vector<2x32xf32>
    %371 = arith.mulf %362, %343 : vector<2x32xf32>
    %372 = arith.mulf %356, %364 : vector<2x32xf32>
    %373 = arith.addf %371, %372 : vector<2x32xf32>
    %374 = math.tanh %373 : vector<2x32xf32>
    %375 = arith.mulf %370, %374 : vector<2x32xf32>
    %376 = math.tanh %375 : vector<2x32xf32>
    %c0_115 = arith.constant 0 : index
    %c96 = arith.constant 96 : index
    %377 = vector.load %arg8[%c0_115, %c96] : memref<2x256xf32, #tpu.memory_space<vmem>>, vector<2x32xf32>
    tpu.vector_store %arg8[%c0_115, %c96], %376 {strides = array<i32>} : memref<2x256xf32, #tpu.memory_space<vmem>>, vector<2x32xf32>,
    %c8_116 = arith.constant 8 : index
    %c0_117 = arith.constant 0 : index
    %378 = vector.load %arg11[%c8_116, %c0_117] : memref<16x128xf32, #tpu.memory_space<vmem>>, vector<2x128xf32>
    %cst_118 = arith.constant dense<0.000000e+00> : vector<2x128xf32>
    %379 = tpu.matmul %375, %255, %cst_118 {dimension_numbers = #tpu.dot_dimension_numbers<[1], [0], [0], [1], [0, 0, 1, 1], [], []>} : vector<2x32xf32>, vector<32x128xf32>, vector<2x128xf32> -> vector<2x128xf32>
    %380 = arith.addf %378, %379 : vector<2x128xf32>
    %381 = vector.extract_strided_slice %380 {offsets = [0, 0], sizes = [2, 32], strides = [1, 1]} : vector<2x128xf32> to vector<2x32xf32>
    %382 = arith.negf %381 : vector<2x32xf32>
    %383 = math.exp %382 : vector<2x32xf32>
    %cst_119 = arith.constant 1.000000e+00 : f32
    %384 = vector.broadcast %cst_119 : f32 to vector<2x32xf32>
    %385 = arith.addf %384, %383 : vector<2x32xf32>
    %386 = arith.divf %384, %385 : vector<2x32xf32>
    %387 = vector.extract_strided_slice %380 {offsets = [0, 32], sizes = [2, 32], strides = [1, 1]} : vector<2x128xf32> to vector<2x32xf32>
    %388 = arith.negf %387 : vector<2x32xf32>
    %389 = math.exp %388 : vector<2x32xf32>
    %cst_120 = arith.constant 1.000000e+00 : f32
    %390 = vector.broadcast %cst_120 : f32 to vector<2x32xf32>
    %391 = arith.addf %390, %389 : vector<2x32xf32>
    %392 = arith.divf %390, %391 : vector<2x32xf32>
    %393 = vector.extract_strided_slice %380 {offsets = [0, 64], sizes = [2, 32], strides = [1, 1]} : vector<2x128xf32> to vector<2x32xf32>
    %394 = math.tanh %393 : vector<2x32xf32>
    %395 = vector.extract_strided_slice %380 {offsets = [0, 96], sizes = [2, 32], strides = [1, 1]} : vector<2x128xf32> to vector<2x32xf32>
    %396 = arith.negf %395 : vector<2x32xf32>
    %397 = math.exp %396 : vector<2x32xf32>
    %cst_121 = arith.constant 1.000000e+00 : f32
    %398 = vector.broadcast %cst_121 : f32 to vector<2x32xf32>
    %399 = arith.addf %398, %397 : vector<2x32xf32>
    %400 = arith.divf %398, %399 : vector<2x32xf32>
    %401 = arith.mulf %392, %373 : vector<2x32xf32>
    %402 = arith.mulf %386, %394 : vector<2x32xf32>
    %403 = arith.addf %401, %402 : vector<2x32xf32>
    %404 = math.tanh %403 : vector<2x32xf32>
    %405 = arith.mulf %400, %404 : vector<2x32xf32>
    %406 = math.tanh %405 : vector<2x32xf32>
    %c0_122 = arith.constant 0 : index
    %c128 = arith.constant 128 : index
    %407 = vector.load %arg8[%c0_122, %c128] : memref<2x256xf32, #tpu.memory_space<vmem>>, vector<2x32xf32>
    tpu.vector_store %arg8[%c0_122, %c128], %406 {strides = array<i32>} : memref<2x256xf32, #tpu.memory_space<vmem>>, vector<2x32xf32>,
    %c10_123 = arith.constant 10 : index
    %c0_124 = arith.constant 0 : index
    %408 = vector.load %arg11[%c10_123, %c0_124] : memref<16x128xf32, #tpu.memory_space<vmem>>, vector<2x128xf32>
    %cst_125 = arith.constant dense<0.000000e+00> : vector<2x128xf32>
    %409 = tpu.matmul %405, %255, %cst_125 {dimension_numbers = #tpu.dot_dimension_numbers<[1], [0], [0], [1], [0, 0, 1, 1], [], []>} : vector<2x32xf32>, vector<32x128xf32>, vector<2x128xf32> -> vector<2x128xf32>
    %410 = arith.addf %408, %409 : vector<2x128xf32>
    %411 = vector.extract_strided_slice %410 {offsets = [0, 0], sizes = [2, 32], strides = [1, 1]} : vector<2x128xf32> to vector<2x32xf32>
    %412 = arith.negf %411 : vector<2x32xf32>
    %413 = math.exp %412 : vector<2x32xf32>
    %cst_126 = arith.constant 1.000000e+00 : f32
    %414 = vector.broadcast %cst_126 : f32 to vector<2x32xf32>
    %415 = arith.addf %414, %413 : vector<2x32xf32>
    %416 = arith.divf %414, %415 : vector<2x32xf32>
    %417 = vector.extract_strided_slice %410 {offsets = [0, 32], sizes = [2, 32], strides = [1, 1]} : vector<2x128xf32> to vector<2x32xf32>
    %418 = arith.negf %417 : vector<2x32xf32>
    %419 = math.exp %418 : vector<2x32xf32>
    %cst_127 = arith.constant 1.000000e+00 : f32
    %420 = vector.broadcast %cst_127 : f32 to vector<2x32xf32>
    %421 = arith.addf %420, %419 : vector<2x32xf32>
    %422 = arith.divf %420, %421 : vector<2x32xf32>
    %423 = vector.extract_strided_slice %410 {offsets = [0, 64], sizes = [2, 32], strides = [1, 1]} : vector<2x128xf32> to vector<2x32xf32>
    %424 = math.tanh %423 : vector<2x32xf32>
    %425 = vector.extract_strided_slice %410 {offsets = [0, 96], sizes = [2, 32], strides = [1, 1]} : vector<2x128xf32> to vector<2x32xf32>
    %426 = arith.negf %425 : vector<2x32xf32>
    %427 = math.exp %426 : vector<2x32xf32>
    %cst_128 = arith.constant 1.000000e+00 : f32
    %428 = vector.broadcast %cst_128 : f32 to vector<2x32xf32>
    %429 = arith.addf %428, %427 : vector<2x32xf32>
    %430 = arith.divf %428, %429 : vector<2x32xf32>
    %431 = arith.mulf %422, %403 : vector<2x32xf32>
    %432 = arith.mulf %416, %424 : vector<2x32xf32>
    %433 = arith.addf %431, %432 : vector<2x32xf32>
    %434 = math.tanh %433 : vector<2x32xf32>
    %435 = arith.mulf %430, %434 : vector<2x32xf32>
    %436 = math.tanh %435 : vector<2x32xf32>
    %c0_129 = arith.constant 0 : index
    %c160 = arith.constant 160 : index
    %437 = vector.load %arg8[%c0_129, %c160] : memref<2x256xf32, #tpu.memory_space<vmem>>, vector<2x32xf32>
    tpu.vector_store %arg8[%c0_129, %c160], %436 {strides = array<i32>} : memref<2x256xf32, #tpu.memory_space<vmem>>, vector<2x32xf32>,
    %c12_130 = arith.constant 12 : index
    %c0_131 = arith.constant 0 : index
    %438 = vector.load %arg11[%c12_130, %c0_131] : memref<16x128xf32, #tpu.memory_space<vmem>>, vector<2x128xf32>
    %cst_132 = arith.constant dense<0.000000e+00> : vector<2x128xf32>
    %439 = tpu.matmul %435, %255, %cst_132 {dimension_numbers = #tpu.dot_dimension_numbers<[1], [0], [0], [1], [0, 0, 1, 1], [], []>} : vector<2x32xf32>, vector<32x128xf32>, vector<2x128xf32> -> vector<2x128xf32>
    %440 = arith.addf %438, %439 : vector<2x128xf32>
    %441 = vector.extract_strided_slice %440 {offsets = [0, 0], sizes = [2, 32], strides = [1, 1]} : vector<2x128xf32> to vector<2x32xf32>
    %442 = arith.negf %441 : vector<2x32xf32>
    %443 = math.exp %442 : vector<2x32xf32>
    %cst_133 = arith.constant 1.000000e+00 : f32
    %444 = vector.broadcast %cst_133 : f32 to vector<2x32xf32>
    %445 = arith.addf %444, %443 : vector<2x32xf32>
    %446 = arith.divf %444, %445 : vector<2x32xf32>
    %447 = vector.extract_strided_slice %440 {offsets = [0, 32], sizes = [2, 32], strides = [1, 1]} : vector<2x128xf32> to vector<2x32xf32>
    %448 = arith.negf %447 : vector<2x32xf32>
    %449 = math.exp %448 : vector<2x32xf32>
    %cst_134 = arith.constant 1.000000e+00 : f32
    %450 = vector.broadcast %cst_134 : f32 to vector<2x32xf32>
    %451 = arith.addf %450, %449 : vector<2x32xf32>
    %452 = arith.divf %450, %451 : vector<2x32xf32>
    %453 = vector.extract_strided_slice %440 {offsets = [0, 64], sizes = [2, 32], strides = [1, 1]} : vector<2x128xf32> to vector<2x32xf32>
    %454 = math.tanh %453 : vector<2x32xf32>
    %455 = vector.extract_strided_slice %440 {offsets = [0, 96], sizes = [2, 32], strides = [1, 1]} : vector<2x128xf32> to vector<2x32xf32>
    %456 = arith.negf %455 : vector<2x32xf32>
    %457 = math.exp %456 : vector<2x32xf32>
    %cst_135 = arith.constant 1.000000e+00 : f32
    %458 = vector.broadcast %cst_135 : f32 to vector<2x32xf32>
    %459 = arith.addf %458, %457 : vector<2x32xf32>
    %460 = arith.divf %458, %459 : vector<2x32xf32>
    %461 = arith.mulf %452, %433 : vector<2x32xf32>
    %462 = arith.mulf %446, %454 : vector<2x32xf32>
    %463 = arith.addf %461, %462 : vector<2x32xf32>
    %464 = math.tanh %463 : vector<2x32xf32>
    %465 = arith.mulf %460, %464 : vector<2x32xf32>
    %466 = math.tanh %465 : vector<2x32xf32>
    %c0_136 = arith.constant 0 : index
    %c192 = arith.constant 192 : index
    %467 = vector.load %arg8[%c0_136, %c192] : memref<2x256xf32, #tpu.memory_space<vmem>>, vector<2x32xf32>
    tpu.vector_store %arg8[%c0_136, %c192], %466 {strides = array<i32>} : memref<2x256xf32, #tpu.memory_space<vmem>>, vector<2x32xf32>,
    %c14_137 = arith.constant 14 : index
    %c0_138 = arith.constant 0 : index
    %468 = vector.load %arg11[%c14_137, %c0_138] : memref<16x128xf32, #tpu.memory_space<vmem>>, vector<2x128xf32>
    %cst_139 = arith.constant dense<0.000000e+00> : vector<2x128xf32>
    %469 = tpu.matmul %465, %255, %cst_139 {dimension_numbers = #tpu.dot_dimension_numbers<[1], [0], [0], [1], [0, 0, 1, 1], [], []>} : vector<2x32xf32>, vector<32x128xf32>, vector<2x128xf32> -> vector<2x128xf32>
    %470 = arith.addf %468, %469 : vector<2x128xf32>
    %471 = vector.extract_strided_slice %470 {offsets = [0, 0], sizes = [2, 32], strides = [1, 1]} : vector<2x128xf32> to vector<2x32xf32>
    %472 = arith.negf %471 : vector<2x32xf32>
    %473 = math.exp %472 : vector<2x32xf32>
    %cst_140 = arith.constant 1.000000e+00 : f32
    %474 = vector.broadcast %cst_140 : f32 to vector<2x32xf32>
    %475 = arith.addf %474, %473 : vector<2x32xf32>
    %476 = arith.divf %474, %475 : vector<2x32xf32>
    %477 = vector.extract_strided_slice %470 {offsets = [0, 32], sizes = [2, 32], strides = [1, 1]} : vector<2x128xf32> to vector<2x32xf32>
    %478 = arith.negf %477 : vector<2x32xf32>
    %479 = math.exp %478 : vector<2x32xf32>
    %cst_141 = arith.constant 1.000000e+00 : f32
    %480 = vector.broadcast %cst_141 : f32 to vector<2x32xf32>
    %481 = arith.addf %480, %479 : vector<2x32xf32>
    %482 = arith.divf %480, %481 : vector<2x32xf32>
    %483 = vector.extract_strided_slice %470 {offsets = [0, 64], sizes = [2, 32], strides = [1, 1]} : vector<2x128xf32> to vector<2x32xf32>
    %484 = math.tanh %483 : vector<2x32xf32>
    %485 = vector.extract_strided_slice %470 {offsets = [0, 96], sizes = [2, 32], strides = [1, 1]} : vector<2x128xf32> to vector<2x32xf32>
    %486 = arith.negf %485 : vector<2x32xf32>
    %487 = math.exp %486 : vector<2x32xf32>
    %cst_142 = arith.constant 1.000000e+00 : f32
    %488 = vector.broadcast %cst_142 : f32 to vector<2x32xf32>
    %489 = arith.addf %488, %487 : vector<2x32xf32>
    %490 = arith.divf %488, %489 : vector<2x32xf32>
    %491 = arith.mulf %482, %463 : vector<2x32xf32>
    %492 = arith.mulf %476, %484 : vector<2x32xf32>
    %493 = arith.addf %491, %492 : vector<2x32xf32>
    %494 = math.tanh %493 : vector<2x32xf32>
    %495 = arith.mulf %490, %494 : vector<2x32xf32>
    %496 = math.tanh %495 : vector<2x32xf32>
    %c0_143 = arith.constant 0 : index
    %c224 = arith.constant 224 : index
    %497 = vector.load %arg8[%c0_143, %c224] : memref<2x256xf32, #tpu.memory_space<vmem>>, vector<2x32xf32>
    tpu.vector_store %arg8[%c0_143, %c224], %496 {strides = array<i32>} : memref<2x256xf32, #tpu.memory_space<vmem>>, vector<2x32xf32>,
    %c1 = arith.constant 1 : index
    %c0_144 = arith.constant 0 : index
    %c0_145 = arith.constant 0 : index
    %498 = vector.load %arg9[%c1, %c0_144, %c0_145] : memref<2x2x32xf32, #tpu.memory_space<vmem>>, vector<1x2x32xf32>
    %499 = vector.shape_cast %498 : vector<1x2x32xf32> to vector<2x32xf32>
    %500 = vector.shape_cast %495 : vector<2x32xf32> to vector<1x2x32xf32>
    tpu.vector_store %arg9[%c1, %c0_144, %c0_145], %500 {strides = array<i32>} : memref<2x2x32xf32, #tpu.memory_space<vmem>>, vector<1x2x32xf32>,
    %c1_146 = arith.constant 1 : index
    %c0_147 = arith.constant 0 : index
    %c0_148 = arith.constant 0 : index
    %501 = vector.load %arg10[%c1_146, %c0_147, %c0_148] : memref<2x2x32xf32, #tpu.memory_space<vmem>>, vector<1x2x32xf32>
    %502 = vector.shape_cast %501 : vector<1x2x32xf32> to vector<2x32xf32>
    %503 = vector.shape_cast %493 : vector<2x32xf32> to vector<1x2x32xf32>
    tpu.vector_store %arg10[%c1_146, %c0_147, %c0_148], %503 {strides = array<i32>} : memref<2x2x32xf32, #tpu.memory_space<vmem>>, vector<1x2x32xf32>,
    return
  }
  func.func @transform_0(%arg0: i32) -> (i32, i32) {
    %c0_i32 = arith.constant 0 : i32
    %c0_i32_0 = arith.constant 0 : i32
    %c0_i32_1 = arith.constant 0 : i32
    return %c0_i32, %c0_i32_0 : i32, i32
  }
  func.func @transform_1(%arg0: i32) -> (i32, i32) {
    %c0_i32 = arith.constant 0 : i32
    %c0_i32_0 = arith.constant 0 : i32
    %c0_i32_1 = arith.constant 0 : i32
    return %c0_i32, %c0_i32_0 : i32, i32
  }
  func.func @transform_2(%arg0: i32) -> (i32, i32) {
    %c0_i32 = arith.constant 0 : i32
    %c0_i32_0 = arith.constant 0 : i32
    %c0_i32_1 = arith.constant 0 : i32
    return %c0_i32, %c0_i32_0 : i32, i32
  }
  func.func @transform_3(%arg0: i32) -> (i32, i32) {
    %c0_i32 = arith.constant 0 : i32
    %c0_i32_0 = arith.constant 0 : i32
    %c0_i32_1 = arith.constant 0 : i32
    return %c0_i32, %c0_i32_0 : i32, i32
  }
  func.func @transform_4(%arg0: i32) -> (i32, i32) {
    %c0_i32 = arith.constant 0 : i32
    %c0_i32_0 = arith.constant 0 : i32
    %c0_i32_1 = arith.constant 0 : i32
    return %c0_i32, %c0_i32_0 : i32, i32
  }
  func.func @transform_5(%arg0: i32) -> (i32, i32) {
    %c0_i32 = arith.constant 0 : i32
    %c0_i32_0 = arith.constant 0 : i32
    %c0_i32_1 = arith.constant 0 : i32
    return %c0_i32, %c0_i32_0 : i32, i32
  }
  func.func @transform_6(%arg0: i32) -> (i32, i32) {
    %c0_i32 = arith.constant 0 : i32
    %c0_i32_0 = arith.constant 0 : i32
    %c0_i32_1 = arith.constant 0 : i32
    return %c0_i32, %c0_i32_0 : i32, i32
  }
  func.func @transform_7(%arg0: i32) -> (i32, i32) {
    %c0_i32 = arith.constant 0 : i32
    %c0_i32_0 = arith.constant 0 : i32
    %c0_i32_1 = arith.constant 0 : i32
    return %c0_i32, %c0_i32_0 : i32, i32
  }
  func.func @transform_8(%arg0: i32) -> (i32, i32, i32) {
    %c0_i32 = arith.constant 0 : i32
    %c0_i32_0 = arith.constant 0 : i32
    %c0_i32_1 = arith.constant 0 : i32
    %c0_i32_2 = arith.constant 0 : i32
    return %c0_i32, %c0_i32_0, %c0_i32_1 : i32, i32, i32
  }
  func.func @transform_9(%arg0: i32) -> (i32, i32, i32) {
    %c0_i32 = arith.constant 0 : i32
    %c0_i32_0 = arith.constant 0 : i32
    %c0_i32_1 = arith.constant 0 : i32
    %c0_i32_2 = arith.constant 0 : i32
    return %c0_i32, %c0_i32_0, %c0_i32_1 : i32, i32, i32
  }
}

</mosaic_0001>

<bundles_post_ra>
// kernel: tpu_custom_call.1
= control target key start
LH: loop header
LB: loop body
LE: loop exit
PB: predicated region body
PF: predicated region fallthrough
CT: control target
= control target key end

     0   :  { %15 = vsyncpa [#allocation5], 0  ;;  %s3183_s0 = inlined_call_operand.vmem [shape: f32[16,8], index: 0, kind: input, shape index: {}]   ;;  %s3184_s1 = inlined_call_operand.hbm [shape: f32[8,128], index: 1, kind: input, shape index: {}]   ;;  %s3185_s2 = inlined_call_operand.hbm [shape: f32[32,128], index: 2, kind: input, shape index: {}]   ;;  %s3186_s3 = inlined_call_operand.vmem [shape: f32[1,128], index: 3, kind: input, shape index: {}]   ;;  %s3187_s4 = inlined_call_operand.vmem [shape: f32[32,128], index: 4, kind: input, shape index: {}]   ;;  %s3188_s5 = inlined_call_operand.hbm [shape: f32[32,128], index: 5, kind: input, shape index: {}]   ;;  %s3189_s6 = inlined_call_operand.vmem [shape: f32[1,128], index: 6, kind: input, shape index: {}]   ;;  %s3190_s7 = inlined_call_operand.hbm [shape: f32[2,256], index: 7, kind: output, shape index: {0}]   ;;  %s3191_s8 = inlined_call_operand.hbm [shape: f32[2,2,32], index: 8, kind: output, shape index: {1}]   ;;  %s3192_s9 = inlined_call_operand.hbm [shape: f32[2,2,32], index: 9, kind: output, shape index: {2}]  }
   0x1   :  { %16 = vsyncpa [#allocation8], 0 }
   0x2   :  { %17 = vsyncpa [#allocation6], 0 }
   0x3   :  { %18 = vsyncpa [#allocation12], 0  ;;  %s2769_s30 = smov [#allocation7]   ;;  %s2629_s13 = scalar_lea.hbm %s3185_s2, 512 }
   0x4   :  { %s36_s10 = sshll.u32 %s2769_s30, 4  ;;  %p2630_p0 = scmp.ne.s32.totalorder %s3185_s2, %s2629_s13  ;;  %s37_s10 = int_to_ptr.vmem [resolvable:$true] %s36_s10 }
   0x5   :  { %p2633_p1 = scmp.lt.u32.totalorder %s2629_s13, %s3185_s2 }
   0x7   :  { %p2635_p2 = pnand %p2633_p1, %p2630_p0 }
   0x9   :  { %2638 = shalt.err (!%p2635_p2)
}
   0xa   :  { %s2639_s18 = scalar_lea.vmem %s37_s10, 512  ;;  %p2644_p4 = scmp.lt.s32.totalorder %s37_s10, %s37_s10 }
   0xb   :  { %p2640_p3 = scmp.ne.s32.totalorder %s37_s10, %s2639_s18  ;;  %p2645_p5 = scmp.lt.s32.totalorder %s2639_s18, %s2639_s18 }
   0xd   :  { %p2646_p6 = por %p2645_p5, %p2644_p4 }
   0xf   :  { %p2647_p7 = pnand %p2646_p6, %p2640_p3 }
  0x11   :  { %2650 = shalt.err (!%p2647_p7)
}
  0x12   :  { %s2770_s19 = smov 128   ;;  %s2771_s20 = smov 8  }
  0x13   :  { %42 = dma.hbm_to_vmem [thread:$0]  %s3185_s2, 512, %s37_s10, [#allocation8], %s2770_s19, %s2770_s19, %s2771_s20  }
  0x14   :  { %s2772_s23 = smov [#allocation4]   ;;  %s2773_s25 = smov [#allocation9]  }
  0x15   :  { %s27_s24 = sshll.u32 %s2772_s23, 4  ;;  %s52_s26 = sshll.u32 %s2773_s25, 4  ;;  %s28_s24 = int_to_ptr.vmem [resolvable:$true] %s27_s24  ;;  %s53_s26 = int_to_ptr.vmem [resolvable:$true] %s52_s26 }
  0x16   :  { %s2651_s29 = scalar_lea.hbm %s3184_s1, 128 }
  0x17   :  { %p2652_p8 = scmp.ne.s32.totalorder %s3184_s1, %s2651_s29  ;;  %p2655_p9 = scmp.lt.u32.totalorder %s2651_s29, %s3184_s1 }
  0x19   :  { %p2657_p10 = pnand %p2655_p9, %p2652_p8 }
  0x1b   :  { %2660 = shalt.err (!%p2657_p10)
}
  0x1c   :  { %s2661_s2 = scalar_lea.vmem %s28_s24, 128  ;;  %p2666_p12 = scmp.lt.s32.totalorder %s28_s24, %s28_s24 }
  0x1d   :  { %p2662_p11 = scmp.ne.s32.totalorder %s28_s24, %s2661_s2  ;;  %p2667_p13 = scmp.lt.s32.totalorder %s2661_s2, %s2661_s2 }
  0x1f   :  { %p2668_p0 = por %p2667_p13, %p2666_p12 }
  0x21   :  { %p2669_p1 = pnand %p2668_p0, %p2662_p11 }
  0x23   :  { %2672 = shalt.err (!%p2669_p1)
}
  0x24   :  { %30 = dma.hbm_to_vmem [thread:$0]  %s3184_s1, 128, %s28_s24, [#allocation5]  }
  0x25   :  { %s2673_s17 = scalar_lea.hbm %s3188_s5, 512 }
  0x26   :  { %p2674_p2 = scmp.ne.s32.totalorder %s3188_s5, %s2673_s17  ;;  %p2677_p3 = scmp.lt.u32.totalorder %s2673_s17, %s3188_s5 }
  0x28   :  { %p2679_p4 = pnand %p2677_p3, %p2674_p2 }
  0x2a   :  { %2682 = shalt.err (!%p2679_p4)
}
  0x2b   :  { %s2683_s25 = scalar_lea.vmem %s53_s26, 512  ;;  %p2688_p6 = scmp.lt.s32.totalorder %s53_s26, %s53_s26 }
  0x2c   :  { %p2684_p5 = scmp.ne.s32.totalorder %s53_s26, %s2683_s25  ;;  %p2689_p7 = scmp.lt.s32.totalorder %s2683_s25, %s2683_s25 }
  0x2e   :  { %p2690_p8 = por %p2689_p7, %p2688_p6 }
  0x30   :  { %p2691_p9 = pnand %p2690_p8, %p2684_p5 }
  0x32   :  { %2694 = shalt.err (!%p2691_p9)
}
  0x33   :  { %58 = dma.hbm_to_vmem [thread:$0]  %s3188_s5, 512, %s53_s26, [#allocation8], %s2770_s19, %s2770_s19, %s2771_s20  }
  0x34   :  { %2761 = dma.done.wait [#allocation5], 128  }
  0x35   :  { %2762 = vsyncadd [#allocation5], 4294967168 }
  0x36   :  { %2763 = dma.done.wait [#allocation8], 1024  }
  0x37   :  { %2764 = vsyncadd [#allocation8], 4294966272  ;;  %v2774_v0 = vmov 0.0|0.0   ;;  %vm2775_vm0 = vmmov 0   ;;  %v2776_v1 = vmov 0.0   ;;  %vm80_vm1 = vcmask 64512  }
  0x38   :  { %2365 = vmatprep.subr.bf16.mxu1 %v2774_v0  ;;  %2186 = vmatprep.mubr.msk.f32.mxu1 %vm2775_vm0, %v2776_v1  ;;  %v72_v2 = vld [vmem:[#allocation4] sm:$0xff]  ;;  %v71_v4 = vld [vmem:[%s3183_s0 + $0x8] sm:$0xff]  ;;  %v165_v6 = vld [vmem:[#allocation7 + $0x8] sm:$0xff]  ;;  %s2777_s20 = smov 64   ;;  %vm272_vm2 = vcmask 254976   ;;  %vm169_vm3 = vcmask 261120  }
  0x39   :  { %v70_v3 = vld [vmem:[%s3183_s0] sm:$0xff]  ;;  %2173 = vmatprep.subr.mxu0 %v72_v2  ;;  %v164_v5 = vld [vmem:[#allocation7] sm:$0xff]  ;;  %v166_v7 = vld [vmem:[#allocation7 + $0x10] sm:$0xff]  ;;  %vm1323_vm4 = vcmask 517376   ;;  %vm1438_vm5 = vcmask 779776   ;;  %vm1542_vm6 = vcmask 1042176  }
  0x3a   :  { %2175 = vmatprep.mubr.msk.f32.mxu0 %vm80_vm1, %v70_v3  ;;  %2174 = vmatpush3.msra.mxu0 %v72_v2  ;;  %v2886_v8 = vpack.c.bf16 %v165_v6, %v164_v5  ;;  %v167_v9 = vld [vmem:[#allocation7 + $0x18] sm:$0xff]  ;;  %s2781_s16 = smov [#allocation10]  }
  0x3b   :  { %2176 = vmatmul.mubr.msk.f32.vlgmr.msra.gmra.mrb[0].mxu0 %vm80_vm1, %v71_v4  ;;  %2371 = vmatprep.subr.bf16.mxu0 %v2774_v0  ;;  %v2890_v10 = vpack.c.bf16 %v167_v9, %v166_v7  ;;  %v2048_v11 = vld [vmem:[%s3186_s3] ss:$0 sm:$0xff]  ;;  %s2778_s3 = smov 32   ;;  %s2007_s17 = sshll.u32 %s2781_s16, 4  ;;  %s2008_s17 = int_to_ptr.vmem [resolvable:$true] %s2007_s17 }
  0x3c   :  { %2367 = vmatpush3.bf16.msra.mxu1 %v2886_v8  ;;  %2373 = vmatpush3.bf16.msra.mxu0 %v2886_v8  ;;  %s2695_s18 = scalar_lea.vmem %s2008_s17, 64  ;;  %p2700_p11 = scmp.lt.s32.totalorder %s2008_s17, %s2008_s17 }
  0x3d   :  { %2368 = vmatprep.subr.bf16.mxu1 %v2774_v0  ;;  %2374 = vmatprep.subr.bf16.mxu0 %v2774_v0  ;;  %p2696_p10 = scmp.ne.s32.totalorder %s2008_s17, %s2695_s18  ;;  %p2701_p12 = scmp.lt.s32.totalorder %s2695_s18, %s2695_s18 }
  0x3e   :  { %2197 = vmatprep.mubr.msk.f32.mxu0 %vm2775_vm0, %v2776_v1 }
  0x3f   :  { %p2702_p13 = por %p2701_p12, %p2700_p11 }
  0x40   :  { %2370 = vmatpush3.bf16.msra.mxu1 %v2890_v10  ;;  %2376 = vmatpush3.bf16.msra.mxu0 %v2890_v10 }
  0x41   :  { %2377 = vmatprep.subr.bf16.mxu1 %v2774_v0  ;;  %2383 = vmatprep.subr.bf16.mxu0 %v2774_v0  ;;  %p2703_p0 = pnand %p2702_p13, %p2696_p10 }
  0x43   :  { %2187 = vmatmul.mubr.f32.vlgmr.msra.gmra.mrb[0].mxu1 %v2776_v1 }
  0x44   :  { %2379 = vmatpush3.bf16.msra.mxu1 %v2886_v8  ;;  %2208 = vmatprep.mubr.msk.f32.mxu1 %vm2775_vm0, %v2776_v1 }
  0x45   :  { %2380 = vmatprep.subr.bf16.mxu1 %v2774_v0 }
  0x48   :  { %2382 = vmatpush3.bf16.msra.mxu1 %v2890_v10 }
  0x49   :  { %2389 = vmatprep.subr.bf16.mxu1 %v2774_v0 }
 0x10e   :  { %v2177_v12 = vpop.f32.mrb[0].mxu0 }
 0x10f   :  { %v159_v13 = vadd.f32 %v2177_v12, %v2048_v11  ;;  %v153_v14 = vpop.f32.mrb[1].mxu0 }
 0x110   :  { %v154_v15 = vadd.f32 %v2048_v11, %v153_v14 }
 0x111   :  { %163 = vst [vmem:[#allocation2 + $0x8] sm:$0xff] %v159_v13 }
 0x112   :  { %162 = vst [vmem:[#allocation2] sm:$0xff] %v154_v15 }
 0x116   :  { %v239_v16 = vpop.f32.mrb[0].mxu1 }
 0x117   :  { %v2188_v17 = vpop.f32.mrb[1].mxu1 }
 0x119   :  { %v168_v18 = vld [vmem:[#allocation2] sm:$0x3]  ;;  %v274_v34 = vld [vmem:[#allocation2 + $0x2] sm:$0x3]  ;;  %v377_v52 = vld [vmem:[#allocation2 + $0x4] sm:$0x3] }
 0x11a   :  { %v243_v19 = vadd.f32 %v239_v16, %v168_v18  ;;  %v480_v9 = vld [vmem:[#allocation2 + $0x6] sm:$0x3] }
 0x11c   :  { %2485 = vtanh.f32 %v243_v19  ;;  %v2051_v21 = vmul.f32 -1.442695, %v243_v19 }
 0x11e   :  { %2487 = vpow2.f32 %v2051_v21 }
 0x126   :  { %v2486_v20 = vpop.eup %2485 }
 0x127   :  { %253 = vrot.lane.b32.xlu0 %v2486_v20, %s2777_s20 }
 0x128   :  { %v2488_v22 = vpop.eup %2487 }
 0x129   :  { %v247_v23 = vadd.f32 1.0, %v2488_v22 }
 0x12b   :  { %2489 = vrcp.f32 %v247_v23 }
 0x135   :  { %v2490_v24 = vpop.eup %2489 }
 0x136   :  { %v251_v27 = vmul.f32 0.0, %v2490_v24 }
 0x199   :  { %v254_v25 = vpop.permute.xlu0 %253 }
 0x19a   :  { %v256_v26 = vmul.f32 %v2490_v24, %v254_v25 }
 0x19c   :  { %258 = vrot.lane.b32.xlu0 %v256_v26, %s2778_s3 }
 0x20e   :  { %v259_v28 = vpop.permute.xlu0 %258 }
 0x20f   :  { %v261_v29 = vadd.f32 %v259_v28, %v251_v27  ;;  %v583_v28 = vld [vmem:[#allocation2 + $0x8] sm:$0x3] }
 0x211   :  { %2491 = vtanh.f32 %v261_v29 }
 0x21b   :  { %v2492_v30 = vpop.eup %2491 }
 0x21c   :  { %264 = vrot.lane.b32.xlu1 %v2492_v30, %s2777_s20 }
 0x28e   :  { %v265_v31 = vpop.permute.xlu1 %264 }
 0x28f   :  { %v267_v32 = vmul.f32 %v2490_v24, %v265_v31 }
 0x291   :  { %269 = vrot.lane.b32.xlu1 %v267_v32, %s2778_s3 }
 0x303   :  { %v270_v33 = vpop.permute.xlu1 %269 }
 0x304   :  { %273 = vst.msk [vmem:[#allocation3] sm:$0x3] %vm272_vm2, %v270_v33  ;;  %2198 = vmatmul.mubr.msk.f32.vlgmr.msra.gmra.mrb[2].mxu0 %vm169_vm3, %v270_v33 }
 0x305   :  { %2385 = vmatpush3.bf16.msra.mxu0 %v2886_v8  ;;  %2219 = vmatprep.mubr.msk.f32.mxu0 %vm2775_vm0, %v2776_v1 }
 0x306   :  { %2386 = vmatprep.subr.bf16.mxu0 %v2774_v0 }
 0x309   :  { %2388 = vmatpush3.bf16.msra.mxu0 %v2890_v10 }
 0x30a   :  { %2395 = vmatprep.subr.bf16.mxu0 %v2774_v0 }
 0x3d7   :  { %v343_v35 = vpop.f32.mrb[2].mxu0 }
 0x3d8   :  { %v347_v36 = vadd.f32 %v343_v35, %v274_v34  ;;  %v2199_v37 = vpop.f32.mrb[3].mxu0 }
 0x3da   :  { %2493 = vtanh.f32 %v347_v36  ;;  %v2053_v39 = vmul.f32 -1.442695, %v347_v36 }
 0x3dc   :  { %2495 = vpow2.f32 %v2053_v39 }
 0x3e4   :  { %v2494_v38 = vpop.eup %2493 }
 0x3e5   :  { %357 = vrot.lane.b32.xlu0 %v2494_v38, %s2777_s20 }
 0x3e6   :  { %v2496_v40 = vpop.eup %2495 }
 0x3e7   :  { %v351_v41 = vadd.f32 1.0, %v2496_v40 }
 0x3e9   :  { %2497 = vrcp.f32 %v351_v41 }
 0x3f3   :  { %v2498_v42 = vpop.eup %2497 }
 0x3f4   :  { %v355_v45 = vmul.f32 %v2498_v42, %v261_v29 }
 0x457   :  { %v358_v43 = vpop.permute.xlu0 %357 }
 0x458   :  { %v360_v44 = vmul.f32 %v2498_v42, %v358_v43 }
 0x45a   :  { %362 = vrot.lane.b32.xlu1 %v360_v44, %s2778_s3 }
 0x4cc   :  { %v363_v46 = vpop.permute.xlu1 %362 }
 0x4cd   :  { %v365_v47 = vadd.f32 %v363_v46, %v355_v45  ;;  %v686_v46 = vld [vmem:[#allocation2 + $0xa] sm:$0x3] }
 0x4cf   :  { %2499 = vtanh.f32 %v365_v47 }
 0x4d9   :  { %v2500_v48 = vpop.eup %2499 }
 0x4da   :  { %368 = vrot.lane.b32.xlu0 %v2500_v48, %s2777_s20 }
 0x54c   :  { %v369_v49 = vpop.permute.xlu0 %368 }
 0x54d   :  { %v371_v50 = vmul.f32 %v2498_v42, %v369_v49 }
 0x54f   :  { %373 = vrot.lane.b32.xlu1 %v371_v50, %s2778_s3 }
 0x5c1   :  { %v374_v51 = vpop.permute.xlu1 %373 }
 0x5c2   :  { %376 = vst.msk [vmem:[#allocation3 + $0x2] sm:$0x3] %vm272_vm2, %v374_v51  ;;  %2209 = vmatmul.mubr.msk.f32.vlgmr.msra.gmra.mrb[2].mxu1 %vm169_vm3, %v374_v51 }
 0x5c3   :  { %2391 = vmatpush3.bf16.msra.mxu1 %v2886_v8  ;;  %2230 = vmatprep.mubr.msk.f32.mxu1 %vm2775_vm0, %v2776_v1 }
 0x5c4   :  { %2392 = vmatprep.subr.bf16.mxu1 %v2774_v0 }
 0x5c7   :  { %2394 = vmatpush3.bf16.msra.mxu1 %v2890_v10 }
 0x5c8   :  { %2401 = vmatprep.subr.bf16.mxu1 %v2774_v0 }
 0x695   :  { %v446_v53 = vpop.f32.mrb[2].mxu1 }
 0x696   :  { %v450_v54 = vadd.f32 %v446_v53, %v377_v52  ;;  %v2210_v55 = vpop.f32.mrb[3].mxu1 }
 0x698   :  { %2501 = vtanh.f32 %v450_v54  ;;  %v2055_v57 = vmul.f32 -1.442695, %v450_v54 }
 0x69a   :  { %2503 = vpow2.f32 %v2055_v57 }
 0x6a2   :  { %v2502_v56 = vpop.eup %2501 }
 0x6a3   :  { %460 = vrot.lane.b32.xlu0 %v2502_v56, %s2777_s20 }
 0x6a4   :  { %v2504_v58 = vpop.eup %2503 }
 0x6a5   :  { %v454_v59 = vadd.f32 1.0, %v2504_v58 }
 0x6a7   :  { %2505 = vrcp.f32 %v454_v59 }
 0x6b1   :  { %v2506_v60 = vpop.eup %2505 }
 0x6b2   :  { %v458_v63 = vmul.f32 %v2506_v60, %v365_v47 }
 0x715   :  { %v461_v61 = vpop.permute.xlu0 %460 }
 0x716   :  { %v463_v62 = vmul.f32 %v2506_v60, %v461_v61 }
 0x718   :  { %465 = vrot.lane.b32.xlu1 %v463_v62, %s2778_s3 }
 0x78a   :  { %v466_v2 = vpop.permute.xlu1 %465 }
 0x78b   :  { %v468_v3 = vadd.f32 %v466_v2, %v458_v63  ;;  %v789_v63 = vld [vmem:[#allocation2 + $0xc] sm:$0x3] }
 0x78d   :  { %2507 = vtanh.f32 %v468_v3 }
 0x797   :  { %v2508_v4 = vpop.eup %2507 }
 0x798   :  { %471 = vrot.lane.b32.xlu0 %v2508_v4, %s2777_s20 }
 0x80a   :  { %v472_v5 = vpop.permute.xlu0 %471 }
 0x80b   :  { %v474_v6 = vmul.f32 %v2506_v60, %v472_v5 }
 0x80d   :  { %476 = vrot.lane.b32.xlu1 %v474_v6, %s2778_s3 }
 0x87f   :  { %v477_v7 = vpop.permute.xlu1 %476 }
 0x880   :  { %479 = vst.msk [vmem:[#allocation3 + $0x4] sm:$0x3] %vm272_vm2, %v477_v7  ;;  %2220 = vmatmul.mubr.msk.f32.vlgmr.msra.gmra.mrb[4].mxu0 %vm169_vm3, %v477_v7 }
 0x881   :  { %2397 = vmatpush3.bf16.msra.mxu0 %v2886_v8  ;;  %2241 = vmatprep.mubr.msk.f32.mxu0 %vm2775_vm0, %v2776_v1 }
 0x882   :  { %2398 = vmatprep.subr.bf16.mxu0 %v2774_v0 }
 0x885   :  { %2400 = vmatpush3.bf16.msra.mxu0 %v2890_v10 }
 0x886   :  { %2407 = vmatprep.subr.bf16.mxu0 %v2774_v0 }
 0x953   :  { %v549_v11 = vpop.f32.mrb[4].mxu0 }
 0x954   :  { %v553_v12 = vadd.f32 %v549_v11, %v480_v9  ;;  %v2221_v13 = vpop.f32.mrb[5].mxu0 }
 0x956   :  { %2509 = vtanh.f32 %v553_v12  ;;  %v2057_v15 = vmul.f32 -1.442695, %v553_v12 }
 0x958   :  { %2511 = vpow2.f32 %v2057_v15 }
 0x960   :  { %v2510_v14 = vpop.eup %2509 }
 0x961   :  { %563 = vrot.lane.b32.xlu0 %v2510_v14, %s2777_s20 }
 0x962   :  { %v2512_v16 = vpop.eup %2511 }
 0x963   :  { %v557_v17 = vadd.f32 1.0, %v2512_v16 }
 0x965   :  { %2513 = vrcp.f32 %v557_v17 }
 0x96f   :  { %v2514_v18 = vpop.eup %2513 }
 0x970   :  { %v561_v21 = vmul.f32 %v2514_v18, %v468_v3 }
 0x9d3   :  { %v564_v19 = vpop.permute.xlu0 %563 }
 0x9d4   :  { %v566_v20 = vmul.f32 %v2514_v18, %v564_v19 }
 0x9d6   :  { %568 = vrot.lane.b32.xlu1 %v566_v20, %s2778_s3 }
 0xa48   :  { %v569_v22 = vpop.permute.xlu1 %568 }
 0xa49   :  { %v571_v23 = vadd.f32 %v569_v22, %v561_v21  ;;  %v892_v21 = vld [vmem:[#allocation2 + $0xe] sm:$0x3] }
 0xa4b   :  { %2515 = vtanh.f32 %v571_v23 }
 0xa55   :  { %v2516_v24 = vpop.eup %2515 }
 0xa56   :  { %574 = vrot.lane.b32.xlu0 %v2516_v24, %s2777_s20 }
 0xac8   :  { %v575_v25 = vpop.permute.xlu0 %574 }
 0xac9   :  { %v577_v26 = vmul.f32 %v2514_v18, %v575_v25 }
 0xacb   :  { %579 = vrot.lane.b32.xlu1 %v577_v26, %s2778_s3 }
 0xb3d   :  { %v580_v27 = vpop.permute.xlu1 %579 }
 0xb3e   :  { %582 = vst.msk [vmem:[#allocation3 + $0x6] sm:$0x3] %vm272_vm2, %v580_v27  ;;  %2231 = vmatmul.mubr.msk.f32.vlgmr.msra.gmra.mrb[4].mxu1 %vm169_vm3, %v580_v27 }
 0xb3f   :  { %2403 = vmatpush3.bf16.msra.mxu1 %v2886_v8  ;;  %2252 = vmatprep.mubr.msk.f32.mxu1 %vm2775_vm0, %v2776_v1 }
 0xb40   :  { %2404 = vmatprep.subr.bf16.mxu1 %v2774_v0 }
 0xb43   :  { %2406 = vmatpush3.bf16.msra.mxu1 %v2890_v10 }
 0xb45   :  { %v1001_v62 = vld [vmem:[#allocation3] sm:$0xff] }
 0xc11   :  { %v652_v29 = vpop.f32.mrb[4].mxu1 }
 0xc12   :  { %v656_v30 = vadd.f32 %v652_v29, %v583_v28  ;;  %v2232_v31 = vpop.f32.mrb[5].mxu1 }
 0xc14   :  { %2517 = vtanh.f32 %v656_v30  ;;  %v2059_v33 = vmul.f32 -1.442695, %v656_v30 }
 0xc16   :  { %2519 = vpow2.f32 %v2059_v33 }
 0xc1e   :  { %v2518_v32 = vpop.eup %2517 }
 0xc1f   :  { %666 = vrot.lane.b32.xlu0 %v2518_v32, %s2777_s20 }
 0xc20   :  { %v2520_v34 = vpop.eup %2519 }
 0xc21   :  { %v660_v35 = vadd.f32 1.0, %v2520_v34 }
 0xc23   :  { %2521 = vrcp.f32 %v660_v35 }
 0xc2d   :  { %v2522_v36 = vpop.eup %2521 }
 0xc2e   :  { %v664_v39 = vmul.f32 %v2522_v36, %v571_v23 }
 0xc91   :  { %v667_v37 = vpop.permute.xlu0 %666 }
 0xc92   :  { %v669_v38 = vmul.f32 %v2522_v36, %v667_v37  ;;  %v1004_v37 = vld [vmem:[%s3187_s4 + $0x8] sm:$0xff] }
 0xc94   :  { %671 = vrot.lane.b32.xlu1 %v669_v38, %s2778_s3 }
 0xd06   :  { %v672_v40 = vpop.permute.xlu1 %671 }
 0xd07   :  { %v674_v41 = vadd.f32 %v672_v40, %v664_v39  ;;  %v1005_v39 = vld [vmem:[%s3187_s4 + $0x10] sm:$0xff]  ;;  %v1006_v40 = vld [vmem:[%s3187_s4 + $0x18] sm:$0xff] }
 0xd09   :  { %2523 = vtanh.f32 %v674_v41 }
 0xd13   :  { %v2524_v42 = vpop.eup %2523 }
 0xd14   :  { %677 = vrot.lane.b32.xlu0 %v2524_v42, %s2777_s20  ;;  %v1097_v42 = vld [vmem:[#allocation9] sm:$0xff] }
 0xd86   :  { %v678_v43 = vpop.permute.xlu0 %677 }
 0xd87   :  { %v680_v44 = vmul.f32 %v2522_v36, %v678_v43  ;;  %v1003_v36 = vld [vmem:[%s3187_s4] sm:$0xff]  ;;  %v1098_v43 = vld [vmem:[#allocation9 + $0x8] sm:$0xff] }
 0xd88   :  { %v2413_v38 = vpack.c.bf16 %v1004_v37, %v1003_v36 }
 0xd89   :  { %682 = vrot.lane.b32.xlu1 %v680_v44, %s2778_s3  ;;  %v1099_v44 = vld [vmem:[#allocation9 + $0x10] sm:$0xff] }
 0xd8a   :  { %2414 = vmatprep.subr.bf16.mxu1 %v2413_v38 }
 0xdfb   :  { %v683_v45 = vpop.permute.xlu1 %682 }
 0xdfc   :  { %685 = vst.msk [vmem:[#allocation3 + $0x8] sm:$0x3] %vm272_vm2, %v683_v45  ;;  %2242 = vmatmul.mubr.msk.f32.vlgmr.msra.gmra.mrb[6].mxu0 %vm169_vm3, %v683_v45  ;;  %v3004_v45 = vpack.c.bf16 %v1098_v43, %v1097_v42 }
 0xdfd   :  { %2409 = vmatpush3.bf16.msra.mxu0 %v2886_v8  ;;  %2263 = vmatprep.mubr.msk.f32.mxu0 %vm2775_vm0, %v2776_v1 }
 0xdfe   :  { %2410 = vmatprep.subr.bf16.mxu0 %v2774_v0 }
 0xe01   :  { %2412 = vmatpush3.bf16.msra.mxu0 %v2890_v10 }
 0xe02   :  { %2421 = vmatprep.subr.bf16.mxu0 %v2774_v0 }
 0xecf   :  { %v755_v47 = vpop.f32.mrb[6].mxu0 }
 0xed0   :  { %v759_v48 = vadd.f32 %v755_v47, %v686_v46  ;;  %v2243_v49 = vpop.f32.mrb[7].mxu0  ;;  %v1100_v46 = vld [vmem:[#allocation9 + $0x18] sm:$0xff] }
 0xed1   :  { %v3007_v49 = vpack.c.bf16 %v1100_v46, %v1099_v44 }
 0xed2   :  { %2525 = vtanh.f32 %v759_v48  ;;  %v2061_v51 = vmul.f32 -1.442695, %v759_v48 }
 0xed4   :  { %2527 = vpow2.f32 %v2061_v51 }
 0xedc   :  { %v2526_v50 = vpop.eup %2525 }
 0xedd   :  { %769 = vrot.lane.b32.xlu0 %v2526_v50, %s2777_s20 }
 0xede   :  { %v2528_v8 = vpop.eup %2527 }
 0xedf   :  { %v763_v52 = vadd.f32 1.0, %v2528_v8 }
 0xee1   :  { %2529 = vrcp.f32 %v763_v52 }
 0xeeb   :  { %v2530_v53 = vpop.eup %2529 }
 0xeec   :  { %v767_v10 = vmul.f32 %v2530_v53, %v674_v41  ;;  %v2417_v41 = vpack.c.bf16 %v1006_v40, %v1005_v39 }
 0xf4f   :  { %v770_v54 = vpop.permute.xlu0 %769 }
 0xf50   :  { %v772_v55 = vmul.f32 %v2530_v53, %v770_v54 }
 0xf52   :  { %774 = vrot.lane.b32.xlu1 %v772_v55, %s2778_s3 }
 0xfc4   :  { %v775_v56 = vpop.permute.xlu1 %774 }
 0xfc5   :  { %v777_v57 = vadd.f32 %v775_v56, %v767_v10 }
 0xfc7   :  { %2531 = vtanh.f32 %v777_v57 }
 0xfd1   :  { %v2532_v58 = vpop.eup %2531 }
 0xfd2   :  { %780 = vrot.lane.b32.xlu0 %v2532_v58, %s2777_s20 }
0x1044   :  { %v781_v59 = vpop.permute.xlu0 %780 }
0x1045   :  { %v783_v60 = vmul.f32 %v2530_v53, %v781_v59  ;;  %v2066_v53 = vld [vmem:[%s3189_s6] ss:$0 sm:$0xff]  ;;  %s2780_s6 = smov 96  }
0x1047   :  { %785 = vrot.lane.b32.xlu1 %v783_v60, %s2778_s3 }
0x10b9   :  { %v786_v61 = vpop.permute.xlu1 %785 }
0x10ba   :  { %788 = vst.msk [vmem:[#allocation3 + $0xa] sm:$0x3] %vm272_vm2, %v786_v61  ;;  %2253 = vmatmul.mubr.msk.f32.vlgmr.msra.gmra.mrb[6].mxu1 %vm169_vm3, %v786_v61 }
0x10bb   :  { %2274 = vmatprep.mubr.msk.f32.mxu1 %vm169_vm3, %v1001_v62  ;;  %2416 = vmatpush3.bf16.msra.mxu1 %v2413_v38 }
0x10bc   :  { %2418 = vmatprep.subr.bf16.mxu1 %v2417_v41 }
0x10bf   :  { %2420 = vmatpush3.bf16.msra.mxu1 %v2417_v41 }
0x10c0   :  { %2427 = vmatprep.subr.bf16.mxu1 %v2774_v0 }
0x118d   :  { %v858_v2 = vpop.f32.mrb[6].mxu1 }
0x118e   :  { %v862_v3 = vadd.f32 %v858_v2, %v789_v63  ;;  %v2254_v4 = vpop.f32.mrb[7].mxu1 }
0x1190   :  { %2533 = vtanh.f32 %v862_v3  ;;  %v2063_v6 = vmul.f32 -1.442695, %v862_v3 }
0x1192   :  { %2535 = vpow2.f32 %v2063_v6 }
0x119a   :  { %v2534_v5 = vpop.eup %2533 }
0x119b   :  { %872 = vrot.lane.b32.xlu0 %v2534_v5, %s2777_s20 }
0x119c   :  { %v2536_v7 = vpop.eup %2535 }
0x119d   :  { %v866_v9 = vadd.f32 1.0, %v2536_v7 }
0x119f   :  { %2537 = vrcp.f32 %v866_v9 }
0x11a9   :  { %v2538_v11 = vpop.eup %2537 }
0x11aa   :  { %v870_v14 = vmul.f32 %v2538_v11, %v777_v57 }
0x120d   :  { %v873_v12 = vpop.permute.xlu0 %872 }
0x120e   :  { %v875_v13 = vmul.f32 %v2538_v11, %v873_v12 }
0x1210   :  { %877 = vrot.lane.b32.xlu1 %v875_v13, %s2778_s3 }
0x1282   :  { %v878_v15 = vpop.permute.xlu1 %877 }
0x1283   :  { %v880_v16 = vadd.f32 %v878_v15, %v870_v14 }
0x1285   :  { %2539 = vtanh.f32 %v880_v16 }
0x128f   :  { %v2540_v17 = vpop.eup %2539 }
0x1290   :  { %883 = vrot.lane.b32.xlu0 %v2540_v17, %s2777_s20 }
0x1302   :  { %v884_v18 = vpop.permute.xlu0 %883 }
0x1303   :  { %v886_v19 = vmul.f32 %v2538_v11, %v884_v18 }
0x1305   :  { %888 = vrot.lane.b32.xlu1 %v886_v19, %s2778_s3 }
0x1377   :  { %v889_v20 = vpop.permute.xlu1 %888 }
0x1378   :  { %891 = vst.msk [vmem:[#allocation3 + $0xc] sm:$0x3] %vm272_vm2, %v889_v20  ;;  %2264 = vmatmul.mubr.msk.f32.vlgmr.msra.gmra.mrb[8].mxu0 %vm169_vm3, %v889_v20 }
0x1379   :  { %2285 = vmatprep.mubr.msk.f32.mxu0 %vm2775_vm0, %v2776_v1  ;;  %2423 = vmatpush3.bf16.msra.mxu0 %v3004_v45 }
0x137a   :  { %2424 = vmatprep.subr.bf16.mxu0 %v2774_v0 }
0x137d   :  { %2426 = vmatpush3.bf16.msra.mxu0 %v3007_v49 }
0x137e   :  { %2433 = vmatprep.subr.bf16.mxu0 %v2774_v0 }
0x1380   :  { %2286 = vmatmul.mubr.f32.vlgmr.msra.gmra.mrb[10].mxu0 %v2776_v1 }
0x1381   :  { %2435 = vmatpush3.bf16.msra.mxu0 %v3004_v45  ;;  %2307 = vmatprep.mubr.msk.f32.mxu0 %vm2775_vm0, %v2776_v1 }
0x1382   :  { %2436 = vmatprep.subr.bf16.mxu0 %v2774_v0 }
0x1385   :  { %2438 = vmatpush3.bf16.msra.mxu0 %v3007_v49 }
0x1386   :  { %2445 = vmatprep.subr.bf16.mxu0 %v2774_v0 }
0x144b   :  { %v961_v22 = vpop.f32.mrb[8].mxu0 }
0x144c   :  { %v965_v23 = vadd.f32 %v961_v22, %v892_v21  ;;  %v2265_v24 = vpop.f32.mrb[9].mxu0 }
0x144e   :  { %2541 = vtanh.f32 %v965_v23  ;;  %v2065_v26 = vmul.f32 -1.442695, %v965_v23 }
0x1450   :  { %2543 = vpow2.f32 %v2065_v26 }
0x1453   :  { %v1168_v8 = vpop.f32.mrb[10].mxu0 }
0x1454   :  { %v2287_v52 = vpop.f32.mrb[11].mxu0 }
0x1458   :  { %v2542_v25 = vpop.eup %2541 }
0x1459   :  { %975 = vrot.lane.b32.xlu0 %v2542_v25, %s2777_s20 }
0x145a   :  { %v2544_v27 = vpop.eup %2543 }
0x145b   :  { %v969_v28 = vadd.f32 1.0, %v2544_v27 }
0x145d   :  { %2545 = vrcp.f32 %v969_v28 }
0x1467   :  { %v2546_v29 = vpop.eup %2545 }
0x1468   :  { %v973_v32 = vmul.f32 %v2546_v29, %v880_v16 }
0x14cb   :  { %v976_v30 = vpop.permute.xlu0 %975 }
0x14cc   :  { %v978_v31 = vmul.f32 %v2546_v29, %v976_v30 }
0x14ce   :  { %980 = vrot.lane.b32.xlu1 %v978_v31, %s2778_s3 }
0x1540   :  { %v981_v33 = vpop.permute.xlu1 %980 }
0x1541   :  { %v2987_v34 = vadd.f32 %v981_v33, %v973_v32 }
0x1543   :  { %2547 = vtanh.f32 %v2987_v34 }
0x154d   :  { %v2548_v35 = vpop.eup %2547 }
0x154e   :  { %986 = vrot.lane.b32.xlu0 %v2548_v35, %s2777_s20 }
0x15c0   :  { %v987_v47 = vpop.permute.xlu0 %986 }
0x15c1   :  { %v989_v48 = vmul.f32 %v2546_v29, %v987_v47 }
0x15c3   :  { %991 = vrot.lane.b32.xlu1 %v989_v48, %s2778_s3 }
0x1635   :  { %v992_v50 = vpop.permute.xlu1 %991 }
0x1636   :  { %994 = vst.msk [vmem:[#allocation3 + $0xe] sm:$0x3] %vm272_vm2, %v992_v50  ;;  %995 = vst.msk [vmem:[#allocation11] sm:$0x3] %vm272_vm2, %v992_v50 }
0x163d   :  { %v1002_v51 = vld [vmem:[#allocation3 + $0x8] sm:$0xff] }
0x163e   :  { %2275 = vmatmul.mubr.msk.f32.vlgmr.msra.gmra.mrb[8].mxu1 %vm169_vm3, %v1002_v51 }
0x163f   :  { %2429 = vmatpush3.bf16.msra.mxu1 %v3004_v45  ;;  %2296 = vmatprep.mubr.msk.f32.mxu1 %vm2775_vm0, %v2776_v1 }
0x1640   :  { %2430 = vmatprep.subr.bf16.mxu1 %v2774_v0 }
0x1643   :  { %2432 = vmatpush3.bf16.msra.mxu1 %v3007_v49 }
0x1644   :  { %2439 = vmatprep.subr.bf16.mxu1 %v2774_v0 }
0x1711   :  { %v2276_v54 = vpop.f32.mrb[8].mxu1 }
0x1712   :  { %v1092_v55 = vadd.f32 %v2276_v54, %v2066_v53  ;;  %v1086_v10 = vpop.f32.mrb[9].mxu1 }
0x1713   :  { %v1087_v56 = vadd.f32 %v2066_v53, %v1086_v10 }
0x1714   :  { %1096 = vst [vmem:[#allocation2 + $0x8] sm:$0xff] %v1092_v55 }
0x1715   :  { %1095 = vst [vmem:[#allocation2] sm:$0xff] %v1087_v56 }
0x171c   :  { %v1101_v57 = vld [vmem:[#allocation2] sm:$0x3]  ;;  %v1210_v13 = vld [vmem:[#allocation2 + $0x2] sm:$0x3]  ;;  %v1325_v31 = vld [vmem:[#allocation2 + $0x4] sm:$0x3] }
0x171d   :  { %v1172_v58 = vadd.f32 %v1168_v8, %v1101_v57  ;;  %v1440_v8 = vld [vmem:[#allocation2 + $0x6] sm:$0x3] }
0x171f   :  { %2549 = vtanh.f32 %v1172_v58  ;;  %v2069_v60 = vmul.f32 -1.442695, %v1172_v58 }
0x1721   :  { %2551 = vpow2.f32 %v2069_v60 }
0x1729   :  { %v2550_v59 = vpop.eup %2549 }
0x172a   :  { %1182 = vrot.lane.b32.xlu0 %v2550_v59, %s2777_s20 }
0x172b   :  { %v2552_v61 = vpop.eup %2551 }
0x172c   :  { %v1176_v62 = vadd.f32 1.0, %v2552_v61 }
0x172e   :  { %2553 = vrcp.f32 %v1176_v62 }
0x1738   :  { %v2554_v63 = vpop.eup %2553 }
0x1739   :  { %v1180_v4 = vmul.f32 0.0, %v2554_v63 }
0x179c   :  { %v1183_v2 = vpop.permute.xlu0 %1182 }
0x179d   :  { %v1185_v3 = vmul.f32 %v2554_v63, %v1183_v2 }
0x179f   :  { %1187 = vrot.lane.b32.xlu1 %v1185_v3, %s2778_s3 }
0x1811   :  { %v1188_v5 = vpop.permute.xlu1 %1187 }
0x1812   :  { %v1190_v6 = vadd.f32 %v1188_v5, %v1180_v4 }
0x1814   :  { %2555 = vtanh.f32 %v1190_v6 }
0x181e   :  { %v2556_v7 = vpop.eup %2555 }
0x181f   :  { %1193 = vrot.lane.b32.xlu0 %v2556_v7, %s2777_s20 }
0x1891   :  { %v1194_v9 = vpop.permute.xlu0 %1193 }
0x1892   :  { %v3035_v11 = vmul.f32 %v2554_v63, %v1194_v9 }
0x1894   :  { %1212 = vrot.lane.b32.xlu1 %v3035_v11, %s2778_s3 }
0x1906   :  { %v1213_v12 = vpop.permute.xlu1 %1212 }
0x1907   :  { %2297 = vmatmul.mubr.msk.f32.vlgmr.msra.gmra.mrb[10].mxu1 %vm169_vm3, %v1213_v12 }
0x1908   :  { %2441 = vmatpush3.bf16.msra.mxu1 %v3004_v45  ;;  %2318 = vmatprep.mubr.msk.f32.mxu1 %vm2775_vm0, %v2776_v1 }
0x1909   :  { %2442 = vmatprep.subr.bf16.mxu1 %v2774_v0 }
0x190c   :  { %2444 = vmatpush3.bf16.msra.mxu1 %v3007_v49 }
0x190d   :  { %2451 = vmatprep.subr.bf16.mxu1 %v2774_v0 }
0x19da   :  { %v1282_v14 = vpop.f32.mrb[10].mxu1 }
0x19db   :  { %v1286_v15 = vadd.f32 %v1282_v14, %v1210_v13  ;;  %v2298_v16 = vpop.f32.mrb[11].mxu1 }
0x19dd   :  { %2557 = vtanh.f32 %v1286_v15  ;;  %v2071_v18 = vmul.f32 -1.442695, %v1286_v15 }
0x19df   :  { %2559 = vpow2.f32 %v2071_v18 }
0x19e7   :  { %v2558_v17 = vpop.eup %2557 }
0x19e8   :  { %1296 = vrot.lane.b32.xlu0 %v2558_v17, %s2777_s20 }
0x19e9   :  { %v2560_v19 = vpop.eup %2559 }
0x19ea   :  { %v1290_v20 = vadd.f32 1.0, %v2560_v19 }
0x19ec   :  { %2561 = vrcp.f32 %v1290_v20 }
0x19f6   :  { %v2562_v21 = vpop.eup %2561 }
0x19f7   :  { %v1294_v24 = vmul.f32 %v2562_v21, %v1190_v6  ;;  %v1544_v6 = vld [vmem:[#allocation2 + $0x8] sm:$0x3] }
0x1a5a   :  { %v1297_v22 = vpop.permute.xlu0 %1296 }
0x1a5b   :  { %v1299_v23 = vmul.f32 %v2562_v21, %v1297_v22 }
0x1a5d   :  { %1301 = vrot.lane.b32.xlu1 %v1299_v23, %s2778_s3 }
0x1acf   :  { %v1302_v25 = vpop.permute.xlu1 %1301 }
0x1ad0   :  { %v1304_v26 = vadd.f32 %v1302_v25, %v1294_v24 }
0x1ad2   :  { %2563 = vtanh.f32 %v1304_v26 }
0x1adc   :  { %v2564_v27 = vpop.eup %2563 }
0x1add   :  { %1307 = vrot.lane.b32.xlu0 %v2564_v27, %s2777_s20  ;;  %v1658_v27 = vld [vmem:[#allocation2 + $0xa] sm:$0x3] }
0x1b4f   :  { %v1308_v28 = vpop.permute.xlu0 %1307 }
0x1b50   :  { %v3049_v29 = vmul.f32 %v2562_v21, %v1308_v28 }
0x1b52   :  { %1327 = vrot.lane.b32.xlu1 %v3049_v29, %s2778_s3 }
0x1bc4   :  { %v1328_v30 = vpop.permute.xlu1 %1327 }
0x1bc5   :  { %2308 = vmatmul.mubr.msk.f32.vlgmr.msra.gmra.mrb[12].mxu0 %vm169_vm3, %v1328_v30 }
0x1bc6   :  { %2447 = vmatpush3.bf16.msra.mxu0 %v3004_v45  ;;  %2329 = vmatprep.mubr.msk.f32.mxu0 %vm2775_vm0, %v2776_v1 }
0x1bc7   :  { %2448 = vmatprep.subr.bf16.mxu0 %v2774_v0 }
0x1bca   :  { %2450 = vmatpush3.bf16.msra.mxu0 %v3007_v49 }
0x1bcb   :  { %2457 = vmatprep.subr.bf16.mxu0 %v2774_v0 }
0x1c98   :  { %v1397_v32 = vpop.f32.mrb[12].mxu0 }
0x1c99   :  { %v1401_v33 = vadd.f32 %v1397_v32, %v1325_v31  ;;  %v2309_v35 = vpop.f32.mrb[13].mxu0 }
0x1c9b   :  { %2565 = vtanh.f32 %v1401_v33  ;;  %v2073_v37 = vmul.f32 -1.442695, %v1401_v33 }
0x1c9d   :  { %2567 = vpow2.f32 %v2073_v37 }
0x1ca5   :  { %v2566_v36 = vpop.eup %2565 }
0x1ca6   :  { %1411 = vrot.lane.b32.xlu0 %v2566_v36, %s2777_s20 }
0x1ca7   :  { %v2568_v38 = vpop.eup %2567 }
0x1ca8   :  { %v1405_v39 = vadd.f32 1.0, %v2568_v38 }
0x1caa   :  { %2569 = vrcp.f32 %v1405_v39 }
0x1cb4   :  { %v2570_v40 = vpop.eup %2569 }
0x1cb5   :  { %v1409_v43 = vmul.f32 %v2570_v40, %v1304_v26 }
0x1d18   :  { %v1412_v41 = vpop.permute.xlu0 %1411 }
0x1d19   :  { %v1414_v42 = vmul.f32 %v2570_v40, %v1412_v41 }
0x1d1b   :  { %1416 = vrot.lane.b32.xlu1 %v1414_v42, %s2778_s3 }
0x1d8d   :  { %v1417_v44 = vpop.permute.xlu1 %1416 }
0x1d8e   :  { %v1419_v46 = vadd.f32 %v1417_v44, %v1409_v43  ;;  %v1772_v43 = vld [vmem:[#allocation2 + $0xc] sm:$0x3] }
0x1d90   :  { %2571 = vtanh.f32 %v1419_v46 }
0x1d9a   :  { %v2572_v47 = vpop.eup %2571 }
0x1d9b   :  { %1422 = vrot.lane.b32.xlu0 %v2572_v47, %s2777_s20 }
0x1e0d   :  { %v1423_v48 = vpop.permute.xlu0 %1422 }
0x1e0e   :  { %v3063_v50 = vmul.f32 %v2570_v40, %v1423_v48 }
0x1e10   :  { %1442 = vrot.lane.b32.xlu1 %v3063_v50, %s2778_s3 }
0x1e82   :  { %v1443_v51 = vpop.permute.xlu1 %1442 }
0x1e83   :  { %2319 = vmatmul.mubr.msk.f32.vlgmr.msra.gmra.mrb[12].mxu1 %vm169_vm3, %v1443_v51 }
0x1e84   :  { %2453 = vmatpush3.bf16.msra.mxu1 %v3004_v45  ;;  %2340 = vmatprep.mubr.msk.f32.mxu1 %vm2775_vm0, %v2776_v1 }
0x1e85   :  { %2454 = vmatprep.subr.bf16.mxu1 %v2774_v0 }
0x1e88   :  { %2456 = vmatpush3.bf16.msra.mxu1 %v3007_v49 }
0x1e89   :  { %2463 = vmatprep.subr.bf16.mxu1 %v2774_v0 }
0x1f56   :  { %v1512_v52 = vpop.f32.mrb[12].mxu1 }
0x1f57   :  { %v1516_v53 = vadd.f32 %v1512_v52, %v1440_v8  ;;  %v2320_v54 = vpop.f32.mrb[13].mxu1 }
0x1f59   :  { %2573 = vtanh.f32 %v1516_v53  ;;  %v2075_v10 = vmul.f32 -1.442695, %v1516_v53 }
0x1f5b   :  { %2575 = vpow2.f32 %v2075_v10 }
0x1f63   :  { %v2574_v55 = vpop.eup %2573 }
0x1f64   :  { %1526 = vrot.lane.b32.xlu0 %v2574_v55, %s2777_s20 }
0x1f65   :  { %v2576_v56 = vpop.eup %2575 }
0x1f66   :  { %v1520_v57 = vadd.f32 1.0, %v2576_v56 }
0x1f68   :  { %2577 = vrcp.f32 %v1520_v57 }
0x1f72   :  { %v2578_v58 = vpop.eup %2577 }
0x1f73   :  { %v1524_v61 = vmul.f32 %v2578_v58, %v1419_v46 }
0x1fd6   :  { %v1527_v59 = vpop.permute.xlu0 %1526 }
0x1fd7   :  { %v1529_v60 = vmul.f32 %v2578_v58, %v1527_v59 }
0x1fd9   :  { %1531 = vrot.lane.b32.xlu1 %v1529_v60, %s2778_s3 }
0x204b   :  { %v1532_v62 = vpop.permute.xlu1 %1531 }
0x204c   :  { %v1534_v63 = vadd.f32 %v1532_v62, %v1524_v61  ;;  %v1886_v62 = vld [vmem:[#allocation2 + $0xe] sm:$0x3] }
0x204e   :  { %2579 = vtanh.f32 %v1534_v63 }
0x2058   :  { %v2580_v2 = vpop.eup %2579 }
0x2059   :  { %1537 = vrot.lane.b32.xlu0 %v2580_v2, %s2777_s20 }
0x20cb   :  { %v1538_v3 = vpop.permute.xlu0 %1537 }
0x20cc   :  { %v3077_v4 = vmul.f32 %v2578_v58, %v1538_v3 }
0x20ce   :  { %1546 = vrot.lane.b32.xlu1 %v3077_v4, %s2778_s3 }
0x2140   :  { %v1547_v5 = vpop.permute.xlu1 %1546 }
0x2141   :  { %2330 = vmatmul.mubr.msk.f32.vlgmr.msra.gmra.mrb[14].mxu0 %vm169_vm3, %v1547_v5 }
0x2142   :  { %2459 = vmatpush3.bf16.msra.mxu0 %v3004_v45  ;;  %2351 = vmatprep.mubr.msk.f32.mxu0 %vm2775_vm0, %v2776_v1 }
0x2143   :  { %2460 = vmatprep.subr.bf16.mxu0 %v2774_v0 }
0x2146   :  { %2462 = vmatpush3.bf16.msra.mxu0 %v3007_v49 }
0x2214   :  { %v1616_v7 = vpop.f32.mrb[14].mxu0 }
0x2215   :  { %v1620_v9 = vadd.f32 %v1616_v7, %v1544_v6  ;;  %v2331_v12 = vpop.f32.mrb[15].mxu0 }
0x2216   :  { %v2779_v12 = vmov 1983009808  }
0x2217   :  { %2581 = vtanh.f32 %v1620_v9  ;;  %v2077_v14 = vmul.f32 -1.442695, %v1620_v9 }
0x2219   :  { %2583 = vpow2.f32 %v2077_v14  ;;  %v1202_v14 = vlaneseq }
0x2221   :  { %v2582_v13 = vpop.eup %2581 }
0x2222   :  { %1630 = vrot.lane.b32.xlu0 %v2582_v13, %s2777_s20  ;;  %v1200_v13 = vunpack.c.l.s4 %v2779_v12 }
0x2223   :  { %v2584_v15 = vpop.eup %2583 }
0x2224   :  { %v1624_v16 = vadd.f32 1.0, %v2584_v15  ;;  %v1201_v15 = vunpack.c.0.s8 %v1200_v13 }
0x2226   :  { %2585 = vrcp.f32 %v1624_v16  ;;  %v1203_v16 = vshrl.u32 %v1202_v14, 7 }
0x2230   :  { %v2586_v17 = vpop.eup %2585 }
0x2231   :  { %v1628_v20 = vmul.f32 %v2586_v17, %v1534_v63 }
0x2294   :  { %v1631_v18 = vpop.permute.xlu0 %1630 }
0x2295   :  { %v1633_v19 = vmul.f32 %v2586_v17, %v1631_v18 }
0x2297   :  { %1635 = vrot.lane.b32.xlu1 %v1633_v19, %s2778_s3 }
0x2309   :  { %v1636_v21 = vpop.permute.xlu1 %1635 }
0x230a   :  { %v1638_v22 = vadd.f32 %v1636_v21, %v1628_v20  ;;  %v1204_v20 = vsub.s32 %v1201_v15, %v1203_v16 }
0x230c   :  { %2587 = vtanh.f32 %v1638_v22 }
0x2316   :  { %v2588_v23 = vpop.eup %2587 }
0x2317   :  { %1641 = vrot.lane.b32.xlu0 %v2588_v23, %s2777_s20 }
0x2389   :  { %v1642_v24 = vpop.permute.xlu0 %1641 }
0x238a   :  { %v3090_v25 = vmul.f32 %v2586_v17, %v1642_v24 }
0x238c   :  { %1660 = vrot.lane.b32.xlu1 %v3090_v25, %s2778_s3 }
0x23fe   :  { %v1661_v26 = vpop.permute.xlu1 %1660 }
0x23ff   :  { %2341 = vmatmul.mubr.msk.f32.vlgmr.msra.gmra.mrb[14].mxu1 %vm169_vm3, %v1661_v26 }
0x2400   :  { %2465 = vmatpush3.bf16.msra.mxu1 %v3004_v45  ;;  %2362 = vmatprep.mubr.msk.f32.mxu1 %vm2775_vm0, %v2776_v1 }
0x2401   :  { %2466 = vmatprep.subr.bf16.mxu1 %v2774_v0 }
0x2404   :  { %2468 = vmatpush3.bf16.msra.mxu1 %v3007_v49 }
0x24d2   :  { %v1730_v28 = vpop.f32.mrb[14].mxu1 }
0x24d3   :  { %v1734_v30 = vadd.f32 %v1730_v28, %v1658_v27  ;;  %v2342_v31 = vpop.f32.mrb[15].mxu1 }
0x24d5   :  { %2589 = vtanh.f32 %v1734_v30  ;;  %v2079_v33 = vmul.f32 -1.442695, %v1734_v30 }
0x24d7   :  { %2591 = vpow2.f32 %v2079_v33 }
0x24df   :  { %v2590_v32 = vpop.eup %2589 }
0x24e0   :  { %1744 = vrot.lane.b32.xlu0 %v2590_v32, %s2777_s20 }
0x24e1   :  { %v2592_v35 = vpop.eup %2591 }
0x24e2   :  { %v1738_v36 = vadd.f32 1.0, %v2592_v35 }
0x24e4   :  { %2593 = vrcp.f32 %v1738_v36 }
0x24ee   :  { %v2594_v45 = vpop.eup %2593 }
0x24ef   :  { %v1742_v0 = vmul.f32 %v2594_v45, %v1638_v22 }
0x2552   :  { %v1745_v37 = vpop.permute.xlu0 %1744 }
0x2553   :  { %v1747_v1 = vmul.f32 %v2594_v45, %v1745_v37 }
0x2555   :  { %1749 = vrot.lane.b32.xlu1 %v1747_v1, %s2778_s3 }
0x25c7   :  { %v1750_v49 = vpop.permute.xlu1 %1749 }
0x25c8   :  { %v1752_v38 = vadd.f32 %v1750_v49, %v1742_v0 }
0x25ca   :  { %2595 = vtanh.f32 %v1752_v38 }
0x25d4   :  { %v2596_v39 = vpop.eup %2595 }
0x25d5   :  { %1755 = vrot.lane.b32.xlu0 %v2596_v39, %s2777_s20 }
0x2647   :  { %v1756_v40 = vpop.permute.xlu0 %1755 }
0x2648   :  { %v3103_v41 = vmul.f32 %v2594_v45, %v1756_v40 }
0x264a   :  { %1774 = vrot.lane.b32.xlu1 %v3103_v41, %s2778_s3 }
0x26bc   :  { %v1775_v42 = vpop.permute.xlu1 %1774 }
0x26bd   :  { %2352 = vmatmul.mubr.msk.f32.vlgmr.msra.gmra.mrb[16].mxu0 %vm169_vm3, %v1775_v42 }
0x2790   :  { %v1844_v44 = vpop.f32.mrb[16].mxu0 }
0x2791   :  { %v1848_v46 = vadd.f32 %v1844_v44, %v1772_v43  ;;  %v2353_v47 = vpop.f32.mrb[17].mxu0 }
0x2793   :  { %2597 = vtanh.f32 %v1848_v46  ;;  %v2081_v51 = vmul.f32 -1.442695, %v1848_v46 }
0x2795   :  { %2599 = vpow2.f32 %v2081_v51 }
0x279d   :  { %v2598_v48 = vpop.eup %2597 }
0x279e   :  { %1858 = vrot.lane.b32.xlu0 %v2598_v48, %s2777_s20 }
0x279f   :  { %v2600_v8 = vpop.eup %2599 }
0x27a0   :  { %v1852_v52 = vadd.f32 1.0, %v2600_v8 }
0x27a2   :  { %2601 = vrcp.f32 %v1852_v52 }
0x27ac   :  { %v2602_v53 = vpop.eup %2601 }
0x27ad   :  { %v1856_v10 = vmul.f32 %v2602_v53, %v1752_v38 }
0x2810   :  { %v1859_v54 = vpop.permute.xlu0 %1858 }
0x2811   :  { %v1861_v55 = vmul.f32 %v2602_v53, %v1859_v54 }
0x2813   :  { %1863 = vrot.lane.b32.xlu1 %v1861_v55, %s2778_s3 }
0x2885   :  { %v1864_v56 = vpop.permute.xlu1 %1863 }
0x2886   :  { %v1866_v57 = vadd.f32 %v1864_v56, %v1856_v10 }
0x2888   :  { %2603 = vtanh.f32 %v1866_v57 }
0x2892   :  { %v2604_v58 = vpop.eup %2603 }
0x2893   :  { %1869 = vrot.lane.b32.xlu0 %v2604_v58, %s2777_s20 }
0x2905   :  { %v1870_v59 = vpop.permute.xlu0 %1869 }
0x2906   :  { %v1872_v60 = vmul.f32 %v2602_v53, %v1870_v59 }
0x2908   :  { %1888 = vrot.lane.b32.xlu1 %v1872_v60, %s2778_s3 }
0x297a   :  { %v1889_v61 = vpop.permute.xlu1 %1888 }
0x297b   :  { %2363 = vmatmul.mubr.msk.f32.vlgmr.msra.gmra.mrb[16].mxu1 %vm169_vm3, %v1889_v61 }
0x2a4e   :  { %v1958_v63 = vpop.f32.mrb[16].mxu1 }
0x2a4f   :  { %v1962_v2 = vadd.f32 %v1958_v63, %v1886_v62  ;;  %v2364_v3 = vpop.f32.mrb[17].mxu1 }
0x2a51   :  { %2605 = vtanh.f32 %v1962_v2  ;;  %v2083_v6 = vmul.f32 -1.442695, %v1962_v2 }
0x2a53   :  { %2607 = vpow2.f32 %v2083_v6 }
0x2a5b   :  { %v2606_v5 = vpop.eup %2605 }
0x2a5c   :  { %1972 = vrot.lane.b32.xlu0 %v2606_v5, %s2777_s20 }
0x2a5d   :  { %v2608_v7 = vpop.eup %2607 }
0x2a5e   :  { %v1966_v9 = vadd.f32 1.0, %v2608_v7 }
0x2a60   :  { %2609 = vrcp.f32 %v1966_v9 }
0x2a61   :  { %2611 = vtanh.f32 %v3035_v11 }
0x2a62   :  { %2613 = vtanh.f32 %v3049_v29 }
0x2a63   :  { %2615 = vtanh.f32 %v3063_v50 }
0x2a64   :  { %2617 = vtanh.f32 %v3077_v4 }
0x2a65   :  { %2619 = vtanh.f32 %v3090_v25 }
0x2a6a   :  { %v2610_v17 = vpop.eup %2609 }
0x2a6b   :  { %v2612_v21 = vpop.eup %2611  ;;  %v1970_v26 = vmul.f32 %v2610_v17, %v1866_v57 }
0x2a6c   :  { %v1205_v22 = vrot.slane %v2612_v21, %v1204_v20  ;;  %v2614_v23 = vpop.eup %2613 }
0x2a6d   :  { %v1319_v11 = vrot.slane %v2614_v23, %v1204_v20  ;;  %v2616_v24 = vpop.eup %2615 }
0x2a6e   :  { %v1434_v29 = vrot.slane %v2616_v24, %v1204_v20  ;;  %v2618_v31 = vpop.eup %2617 }
0x2a6f   :  { %v2620_v32 = vpop.eup %2619 }
0x2a70   :  { %v1653_v25 = vrot.slane %v2620_v32, %v1204_v20 }
0x2ace   :  { %v1973_v18 = vpop.permute.xlu0 %1972 }
0x2acf   :  { %v1975_v19 = vmul.f32 %v2610_v17, %v1973_v18 }
0x2ad1   :  { %1977 = vrot.lane.b32.xlu1 %v1975_v19, %s2778_s3 }
0x2ad5   :  { %1206 = vrot.lane.b32.xlu1 %v1205_v22, %s2778_s3 }
0x2ad9   :  { %1320 = vrot.lane.b32.xlu1 %v1319_v11, %s2777_s20 }
0x2add   :  { %1435 = vrot.lane.b32.xlu1 %v1434_v29, %s2780_s6 }
0x2b43   :  { %v1978_v50 = vpop.permute.xlu1 %1977 }
0x2b44   :  { %v1980_v27 = vadd.f32 %v1978_v50, %v1970_v26 }
0x2b46   :  { %2621 = vtanh.f32 %v1980_v27 }
0x2b47   :  { %v1207_v28 = vpop.permute.xlu1 %1206  ;;  %2623 = vtanh.f32 %v3103_v41 }
0x2b48   :  { %1209 = vst.msk [vmem:[#allocation10] sm:$0x3] %vm272_vm2, %v1207_v28  ;;  %2625 = vtanh.f32 %v1872_v60 }
0x2b4b   :  { %v1321_v30 = vpop.permute.xlu1 %1320 }
0x2b4c   :  { %1324 = vst.msk [vmem:[#allocation10] sm:$0x3] %vm1323_vm4, %v1321_v30 }
0x2b4f   :  { %v1436_v33 = vpop.permute.xlu1 %1435 }
0x2b50   :  { %v2622_v4 = vpop.eup %2621  ;;  %1439 = vst.msk [vmem:[#allocation10] sm:$0x3] %vm1438_vm5, %v1436_v33 }
0x2b51   :  { %1983 = vrot.lane.b32.xlu0 %v2622_v4, %s2777_s20  ;;  %1543 = vst.msk [vmem:[#allocation10] sm:$0x3] %vm1542_vm6, %v2618_v31  ;;  %v2624_v35 = vpop.eup %2623 }
0x2b52   :  { %v1767_v36 = vrot.slane %v2624_v35, %v1204_v20  ;;  %v2626_v45 = vpop.eup %2625 }
0x2b53   :  { %v1881_v37 = vrot.slane %v2626_v45, %v1204_v20 }
0x2b55   :  { %1654 = vrot.lane.b32.xlu0 %v1653_v25, %s2778_s3 }
0x2b59   :  { %1768 = vrot.lane.b32.xlu0 %v1767_v36, %s2777_s20 }
0x2b5d   :  { %1882 = vrot.lane.b32.xlu0 %v1881_v37, %s2780_s6 }
0x2b61   :  { %997 = vrot.lane.b32.xlu0 %v2987_v34, %s2780_s6 }
0x2bc3   :  { %v1984_v1 = vpop.permute.xlu0 %1983 }
0x2bc4   :  { %v1986_v0 = vmul.f32 %v2610_v17, %v1984_v1 }
0x2bc6   :  { %2627 = vtanh.f32 %v1986_v0  ;;  %1990 = vrot.lane.b32.xlu1 %v1986_v0, %s2778_s3 }
0x2bc7   :  { %v1655_v49 = vpop.permute.xlu0 %1654 }
0x2bc8   :  { %1657 = vst.msk [vmem:[#allocation10 + $0x2] sm:$0x3] %vm272_vm2, %v1655_v49 }
0x2bca   :  { %1996 = vrot.lane.b32.xlu1 %v1980_v27, %s2780_s6 }
0x2bcb   :  { %v1769_v38 = vpop.permute.xlu0 %1768 }
0x2bcc   :  { %1771 = vst.msk [vmem:[#allocation10 + $0x2] sm:$0x3] %vm1323_vm4, %v1769_v38 }
0x2bcf   :  { %v1883_v39 = vpop.permute.xlu0 %1882 }
0x2bd0   :  { %v2628_v40 = vpop.eup %2627  ;;  %1885 = vst.msk [vmem:[#allocation10 + $0x2] sm:$0x3] %vm1438_vm5, %v1883_v39 }
0x2bd1   :  { %1988 = vst.msk [vmem:[#allocation10 + $0x2] sm:$0x3] %vm1542_vm6, %v2628_v40 }
0x2bd2   :  { %2706 = shalt.err (!%p2703_p0)
}
0x2bd3   :  { %s2707_s23 = scalar_lea.hbm %s3190_s7, 64 }
0x2bd4   :  { %p2708_p1 = scmp.ne.s32.totalorder %s3190_s7, %s2707_s23  ;;  %p2711_p2 = scmp.lt.u32.totalorder %s2707_s23, %s3190_s7 }
0x2bd6   :  { %p2713_p3 = pnand %p2711_p2, %p2708_p1 }
0x2bd8   :  { %2716 = shalt.err (!%p2713_p3)
}
0x2bd9   :  { %2010 = dma.vmem_to_hbm [thread:$0]  %s2008_s17, 64, %s3190_s7, [#allocation6]   ;;  %v998_v34 = vpop.permute.xlu0 %997 }
0x2bda   :  { %1000 = vst.msk [vmem:[#allocation13] sm:$0x3] %vm272_vm2, %v998_v34  ;;  %s2782_s5 = smov [#allocation11]   ;;  %s2783_s19 = smov [#allocation13]  }
0x2bdb   :  { %s2016_s0 = sshll.u32 %s2782_s5, 4  ;;  %s2028_s20 = sshll.u32 %s2783_s19, 4  ;;  %s2017_s0 = int_to_ptr.vmem [resolvable:$true] %s2016_s0  ;;  %s2029_s20 = int_to_ptr.vmem [resolvable:$true] %s2028_s20 }
0x2bdc   :  { %s2717_s26 = scalar_lea.vmem %s2017_s0, 64  ;;  %p2722_p5 = scmp.lt.s32.totalorder %s2017_s0, %s2017_s0 }
0x2bdd   :  { %p2718_p4 = scmp.ne.s32.totalorder %s2017_s0, %s2717_s26  ;;  %p2723_p6 = scmp.lt.s32.totalorder %s2717_s26, %s2717_s26 }
0x2bdf   :  { %p2724_p7 = por %p2723_p6, %p2722_p5 }
0x2be1   :  { %p2725_p8 = pnand %p2724_p7, %p2718_p4 }
0x2c38   :  { %v1991_v41 = vpop.permute.xlu1 %1990 }
0x2c39   :  { %1994 = vst.msk [vmem:[#allocation11 + $0x2] sm:$0x3] %vm272_vm2, %v1991_v41 }
0x2c3a   :  { %2728 = shalt.err (!%p2725_p8)
}
0x2c3b   :  { %s2729_s11 = scalar_lea.hbm %s3191_s8, 64 }
0x2c3c   :  { %p2730_p9 = scmp.ne.s32.totalorder %s3191_s8, %s2729_s11  ;;  %p2733_p10 = scmp.lt.u32.totalorder %s2729_s11, %s3191_s8 }
0x2c3e   :  { %p2735_p11 = pnand %p2733_p10, %p2730_p9 }
0x2c40   :  { %2738 = shalt.err (!%p2735_p11)
}
0x2c41   :  { %s2784_s14 = smov 2   ;;  %v1997_v42 = vpop.permute.xlu1 %1996  ;;  %s2739_s6 = scalar_lea.vmem %s2029_s20, 64 }
0x2c42   :  { %2022 = dma.vmem_to_hbm [thread:$0]  %s2017_s0, 64, %s3191_s8, [#allocation12], %s2778_s3, %s2778_s3, %s2784_s14   ;;  %2000 = vst.msk [vmem:[#allocation13 + $0x2] sm:$0x3] %vm272_vm2, %v1997_v42 }
0x2c43   :  { %p2740_p12 = scmp.ne.s32.totalorder %s2029_s20, %s2739_s6  ;;  %p2744_p13 = scmp.lt.s32.totalorder %s2029_s20, %s2029_s20 }
0x2c44   :  { %p2745_p0 = scmp.lt.s32.totalorder %s2739_s6, %s2739_s6 }
0x2c46   :  { %p2746_p1 = por %p2745_p0, %p2744_p13 }
0x2c48   :  { %p2747_p2 = pnand %p2746_p1, %p2740_p12 }
0x2c4a   :  { %2750 = shalt.err (!%p2747_p2)
}
0x2c4b   :  { %s2751_s18 = scalar_lea.hbm %s3192_s9, 64 }
0x2c4c   :  { %p2752_p3 = scmp.ne.s32.totalorder %s3192_s9, %s2751_s18  ;;  %p2755_p4 = scmp.lt.u32.totalorder %s2751_s18, %s3192_s9 }
0x2c4e   :  { %p2757_p5 = pnand %p2755_p4, %p2752_p3 }
0x2c50   :  { %2760 = shalt.err (!%p2757_p5)
}
0x2c51   :  { %2034 = dma.vmem_to_hbm [thread:$0]  %s2029_s20, 64, %s3192_s9, [#allocation12], %s2778_s3, %s2778_s3, %s2784_s14  }
0x2c52   :  { %2765 = dma.done.wait [#allocation6], 64  }
0x2c53   :  { %2766 = vsyncadd [#allocation6], 4294967232 }
0x2c54   :  { %2767 = dma.done.wait [#allocation12], 128  }
0x2c55   :  { %2768 = vsyncadd [#allocation12], 4294967168 }
0x2c56   :  { %2044 = vsyncpa [#allocation5], 1 }
0x2c57   :  { %2045 = vsyncpa [#allocation8], 1 }
0x2c58   :  { %2046 = vsyncpa [#allocation6], 1 }
0x2c59   :  { %2047 = vsyncpa [#allocation12], 1 }

</bundles_post_ra>
